<compile_context>
chip_gen: v5e
topology: v5e:2x2
jax: 0.10.0
libtpu: 0.0.40
codegen_flags: <defaults>
</compile_context>

<pallas_src>
import jax
import jax.numpy as jnp
from jax.experimental import pallas as pl
from jax.experimental.pallas import tpu as pltpu


# ----------------------------- in-kernel math ------------------------------

def _gelu_tanh(x):
    # tanh-form GELU (EUP-friendly; |err| vs exact erf GELU < ~3e-4).
    c = 0.7978845608028654  # sqrt(2/pi)
    return 0.5 * x * (1.0 + jnp.tanh(c * (x + 0.044715 * x * x * x)))


def _mlp_kernel(x_ref, w1_ref, b1_ref, w2_ref, b2_ref, w3_ref, b3_ref,
                w4_ref, b4_ref, emb_ref, prob_ref):
    """x_ref: (B, TT, D) tile.  emb_ref: (TT, OP).  prob_ref: (TT, CP)."""
    B, TT, D = x_ref.shape

    # Collapse (B, TT, D) -> (B*TT, D): one MXU chain with M = B*TT.
    x = x_ref[...].reshape(B * TT, D).astype(jnp.bfloat16)
    h = _gelu_tanh(jnp.dot(x, w1_ref[...],
                           preferred_element_type=jnp.float32) + b1_ref[...])
    h = _gelu_tanh(jnp.dot(h.astype(jnp.bfloat16), w2_ref[...],
                           preferred_element_type=jnp.float32) + b2_ref[...])
    h = _gelu_tanh(jnp.dot(h.astype(jnp.bfloat16), w3_ref[...],
                           preferred_element_type=jnp.float32) + b3_ref[...])

    # Max over the original batch axis: row slab b covers rows [b*TT, (b+1)*TT).
    emb = h[0:TT]
    for b in range(1, B):
        emb = jnp.maximum(emb, h[b * TT:(b + 1) * TT])
    emb_ref[...] = emb                                   # lane-dense 128-wide store

    # Utterance-level head; padded class columns have bias -1e9 -> exp() == 0.
    logits = jnp.dot(emb, w4_ref[...],
                     preferred_element_type=jnp.float32) + b4_ref[...]
    m = jnp.max(logits, axis=-1, keepdims=True)
    e = jnp.exp(logits - m)
    inv = pl.reciprocal(jnp.sum(e, axis=-1, keepdims=True), approx=True)
    prob_ref[...] = e * inv                              # lane-dense 128-wide store


# ------------------------------- wrapper ------------------------------------

def _round_up(n, m):
    return ((n + m - 1) // m) * m


def _pick_frame_tile(B, T, D, OP, CP, vmem_budget_bytes=8 << 20):
    """Largest frame tile that divides T, is 8-aligned (or == T) and fits a
    conservative double-buffered VMEM budget; prefer >= 2 grid steps (v7x)."""
    def fits(tt):
        per_step = 4 * B * tt * D + 4 * tt * (OP + CP)   # x tile + padded outputs
        return 2 * per_step <= vmem_budget_bytes          # double buffered
    divs = [d for d in range(1, T + 1) if T % d == 0]
    cands = [d for d in divs if (d % 8 == 0 or d == T) and fits(d)]
    if not cands:
        return T
    multi = [d for d in cands if T // d >= 2]
    return max(multi) if multi else max(cands)


def model_forward(x_big, params, *, is_train=True, frame_tile=None):
    """params: [(w1,b1),(w2,b2),(w3,b3),(w4,b4)]; w_i: (in,out)=W_torch.T, b_i:(1,out)."""
    assert x_big.ndim == 3, "expected (batch, frame_num, feat_dim)"
    B, T, D = x_big.shape
    (w1, b1), (w2, b2), (w3, b3), (w4, b4) = params
    H0, H1, O, C = w1.shape[1], w2.shape[1], w3.shape[1], w4.shape[1]

    OP = _round_up(O, 128)       # padded emb width  (lane-dense stores)
    CP = _round_up(C, 128)       # padded class width

    f32, bf16 = jnp.float32, jnp.bfloat16
    # bf16 matmul inputs (f32 accumulation); pad emb / class axes to 128 lanes.
    w1b = w1.astype(bf16)
    w2b = w2.astype(bf16)
    w3p = jnp.zeros((H1, OP), f32).at[:, :O].set(w3).astype(bf16)
    b3p = jnp.zeros((1, OP), f32).at[:, :O].set(b3)
    w4p = jnp.zeros((OP, CP), f32).at[:O, :C].set(w4)
    b4p = jnp.full((1, CP), -1e9, f32).at[:, :C].set(b4)   # padded classes -> -inf-ish

    TT = frame_tile if frame_tile is not None else _pick_frame_tile(B, T, D, OP, CP)
    assert T % TT == 0 and (TT % 8 == 0 or TT == T), "bad frame tile"

    const2d = lambda i: (0, 0)
    emb_pad, prob_pad = pl.pallas_call(
        _mlp_kernel,
        out_shape=(jax.ShapeDtypeStruct((T, OP), f32),
                   jax.ShapeDtypeStruct((T, CP), f32)),
        grid=(T // TT,),
        in_specs=[
            pl.BlockSpec((B, TT, D), lambda i: (0, i, 0)),   # activations (frame-tiled)
            pl.BlockSpec((D, H0), const2d), pl.BlockSpec((1, H0), const2d),
            pl.BlockSpec((H0, H1), const2d), pl.BlockSpec((1, H1), const2d),
            pl.BlockSpec((H1, OP), const2d), pl.BlockSpec((1, OP), const2d),
            pl.BlockSpec((OP, CP), const2d), pl.BlockSpec((1, CP), const2d),
        ],
        out_specs=(pl.BlockSpec((TT, OP), lambda i: (i, 0)),
                   pl.BlockSpec((TT, CP), lambda i: (i, 0))),
        compiler_params=pltpu.CompilerParams(dimension_semantics=("parallel",)),
    )(x_big, w1b, b1, w2b, b2, w3p, b3p, w4p, b4p)

    probs = prob_pad[:, :C]
    emb = emb_pad[:, :O]
    if is_train:
        return probs, emb, emb   # Model._forward returns (output, emb, emb)
    return probs


# -------------------------- parameter construction --------------------------

def init_params(key, input_dim, hidden_dim, out_dim, num_classes):
    """Deterministic init mimicking torch.nn.Linear (U(-1/sqrt(fan_in), +...))."""
    dims = [(input_dim, hidden_dim[0]),
            (hidden_dim[0], hidden_dim[1]),
            (hidden_dim[1], out_dim),
            (out_dim, num_classes)]
    params = []
    for fan_in, fan_out in dims:
        key, kw, kb = jax.random.split(key, 3)
        bound = 1.0 / float(fan_in) ** 0.5
        w = jax.random.uniform(kw, (fan_in, fan_out), jnp.float32, -bound, bound)
        b = jax.random.uniform(kb, (1, fan_out), jnp.float32, -bound, bound)
        params.append((w, b))
    return params


# ----------------------- pure-JAX reference (checking) ----------------------

def reference_forward(x_big, params):
    (w1, b1), (w2, b2), (w3, b3), (w4, b4) = params
    gelu = lambda v: 0.5 * v * (1.0 + jax.scipy.special.erf(v / jnp.sqrt(2.0)))
    x = jnp.transpose(x_big, (1, 0, 2))                      # (T, B, D)
    h = gelu(x @ w1 + b1)
    h = gelu(h @ w2 + b2)
    h = gelu(h @ w3 + b3)                                    # (T, B, O)
    emb = jnp.max(h, axis=1)                                 # (T, O)
    logits = emb @ w4 + b4                                   # (T, C)
    return jax.nn.softmax(logits, axis=1), emb


# ---------------------------------- main -------------------------------------

if __name__ == "__main__":
    key = jax.random.PRNGKey(0)
    B, T, D = 2, 256, 32           # (batch, frame_num, feat_dim)
    hidden = (64, 64)
    out_dim, n_classes = 32, 2

    kx, kp = jax.random.split(key)
    x_big = jax.random.normal(kx, (B, T, D), dtype=jnp.float32)
    params = init_params(kp, D, hidden, out_dim, n_classes)

    probs, emb, emb2 = model_forward(x_big, params, is_train=True)
    jax.block_until_ready((probs, emb))

    # correctness checks vs pure-JAX (exact-GELU, f32) reference
    ref_probs, ref_emb = reference_forward(x_big, params)
    assert probs.shape == (T, n_classes) and emb.shape == (T, out_dim)
    assert jnp.allclose(probs, ref_probs, atol=5e-2, rtol=5e-2)
    assert jnp.allclose(emb, ref_emb, atol=5e-2, rtol=5e-2)
    assert jnp.allclose(jnp.sum(probs, axis=1), 1.0, atol=1e-2)
    assert bool(jnp.all(emb == emb2))

    print("KERNEL_OK")
</pallas_src>

<mosaic_0001>
module attributes {stable_mosaic.version = 11 : i64} {
  func.func @_mlp_kernel(%arg0: i32, %arg1: memref<2x128x32xf32, #tpu.memory_space<vmem>>, %arg2: memref<32x64xbf16, #tpu.memory_space<vmem>>, %arg3: memref<1x64xf32, #tpu.memory_space<vmem>>, %arg4: memref<64x64xbf16, #tpu.memory_space<vmem>>, %arg5: memref<1x64xf32, #tpu.memory_space<vmem>>, %arg6: memref<64x128xbf16, #tpu.memory_space<vmem>>, %arg7: memref<1x128xf32, #tpu.memory_space<vmem>>, %arg8: memref<128x128xf32, #tpu.memory_space<vmem>>, %arg9: memref<1x128xf32, #tpu.memory_space<vmem>>, %arg10: memref<128x128xf32, #tpu.memory_space<vmem>>, %arg11: memref<128x128xf32, #tpu.memory_space<vmem>>) attributes {dimension_semantics = [#tpu.dimension_semantics<parallel>], iteration_bounds = array<i64: 2>, scalar_prefetch = 0 : i64, scratch_operands = 0 : i64, tpu.core_type = #tpu.core_type<tc>, window_params = [{transform_indices = @transform_0, window_bounds = array<i64: 2, 128, 32>}, {pipeline_mode = #tpu.pipeline_mode<synchronous>, transform_indices = @transform_1, window_bounds = array<i64: 32, 64>}, {pipeline_mode = #tpu.pipeline_mode<synchronous>, transform_indices = @transform_2, window_bounds = array<i64: 1, 64>}, {pipeline_mode = #tpu.pipeline_mode<synchronous>, transform_indices = @transform_3, window_bounds = array<i64: 64, 64>}, {pipeline_mode = #tpu.pipeline_mode<synchronous>, transform_indices = @transform_4, window_bounds = array<i64: 1, 64>}, {pipeline_mode = #tpu.pipeline_mode<synchronous>, transform_indices = @transform_5, window_bounds = array<i64: 64, 128>}, {pipeline_mode = #tpu.pipeline_mode<synchronous>, transform_indices = @transform_6, window_bounds = array<i64: 1, 128>}, {pipeline_mode = #tpu.pipeline_mode<synchronous>, transform_indices = @transform_7, window_bounds = array<i64: 128, 128>}, {pipeline_mode = #tpu.pipeline_mode<synchronous>, transform_indices = @transform_8, window_bounds = array<i64: 1, 128>}, {transform_indices = @transform_9, window_bounds = array<i64: 128, 128>}, {transform_indices = @transform_10, window_bounds = array<i64: 128, 128>}]} {
    %c0 = arith.constant 0 : index
    %c0_0 = arith.constant 0 : index
    %c0_1 = arith.constant 0 : index
    %0 = vector.load %arg1[%c0, %c0_0, %c0_1] : memref<2x128x32xf32, #tpu.memory_space<vmem>>, vector<2x128x32xf32>
    %1 = vector.shape_cast %0 : vector<2x128x32xf32> to vector<256x32xf32>
    %2 = arith.truncf %1 : vector<256x32xf32> to vector<256x32xbf16>
    %c0_2 = arith.constant 0 : index
    %c0_3 = arith.constant 0 : index
    %3 = vector.load %arg2[%c0_2, %c0_3] : memref<32x64xbf16, #tpu.memory_space<vmem>>, vector<32x64xbf16>
    %cst = arith.constant dense<0.000000e+00> : vector<256x64xf32>
    %4 = tpu.matmul %2, %3, %cst {dimension_numbers = #tpu.dot_dimension_numbers<[1], [0], [0], [1], [0, 0, 1, 1], [], []>} : vector<256x32xbf16>, vector<32x64xbf16>, vector<256x64xf32> -> vector<256x64xf32>
    %c0_4 = arith.constant 0 : index
    %c0_5 = arith.constant 0 : index
    %5 = vector.load %arg3[%c0_4, %c0_5] : memref<1x64xf32, #tpu.memory_space<vmem>>, vector<1x64xf32>
    %6 = vector.broadcast %5 : vector<1x64xf32> to vector<256x64xf32>
    %7 = arith.addf %4, %6 : vector<256x64xf32>
    %cst_6 = arith.constant 5.000000e-01 : f32
    %8 = vector.broadcast %cst_6 : f32 to vector<256x64xf32>
    %9 = arith.mulf %8, %7 : vector<256x64xf32>
    %cst_7 = arith.constant 4.471500e-02 : f32
    %10 = vector.broadcast %cst_7 : f32 to vector<256x64xf32>
    %11 = arith.mulf %10, %7 : vector<256x64xf32>
    %12 = arith.mulf %11, %7 : vector<256x64xf32>
    %13 = arith.mulf %12, %7 : vector<256x64xf32>
    %14 = arith.addf %7, %13 : vector<256x64xf32>
    %cst_8 = arith.constant 0.797884583 : f32
    %15 = vector.broadcast %cst_8 : f32 to vector<256x64xf32>
    %16 = arith.mulf %15, %14 : vector<256x64xf32>
    %17 = math.tanh %16 : vector<256x64xf32>
    %cst_9 = arith.constant 1.000000e+00 : f32
    %18 = vector.broadcast %cst_9 : f32 to vector<256x64xf32>
    %19 = arith.addf %18, %17 : vector<256x64xf32>
    %20 = arith.mulf %9, %19 : vector<256x64xf32>
    %21 = arith.truncf %20 : vector<256x64xf32> to vector<256x64xbf16>
    %c0_10 = arith.constant 0 : index
    %c0_11 = arith.constant 0 : index
    %22 = vector.load %arg4[%c0_10, %c0_11] : memref<64x64xbf16, #tpu.memory_space<vmem>>, vector<64x64xbf16>
    %cst_12 = arith.constant dense<0.000000e+00> : vector<256x64xf32>
    %23 = tpu.matmul %21, %22, %cst_12 {dimension_numbers = #tpu.dot_dimension_numbers<[1], [0], [0], [1], [0, 0, 1, 1], [], []>} : vector<256x64xbf16>, vector<64x64xbf16>, vector<256x64xf32> -> vector<256x64xf32>
    %c0_13 = arith.constant 0 : index
    %c0_14 = arith.constant 0 : index
    %24 = vector.load %arg5[%c0_13, %c0_14] : memref<1x64xf32, #tpu.memory_space<vmem>>, vector<1x64xf32>
    %25 = vector.broadcast %24 : vector<1x64xf32> to vector<256x64xf32>
    %26 = arith.addf %23, %25 : vector<256x64xf32>
    %cst_15 = arith.constant 5.000000e-01 : f32
    %27 = vector.broadcast %cst_15 : f32 to vector<256x64xf32>
    %28 = arith.mulf %27, %26 : vector<256x64xf32>
    %cst_16 = arith.constant 4.471500e-02 : f32
    %29 = vector.broadcast %cst_16 : f32 to vector<256x64xf32>
    %30 = arith.mulf %29, %26 : vector<256x64xf32>
    %31 = arith.mulf %30, %26 : vector<256x64xf32>
    %32 = arith.mulf %31, %26 : vector<256x64xf32>
    %33 = arith.addf %26, %32 : vector<256x64xf32>
    %cst_17 = arith.constant 0.797884583 : f32
    %34 = vector.broadcast %cst_17 : f32 to vector<256x64xf32>
    %35 = arith.mulf %34, %33 : vector<256x64xf32>
    %36 = math.tanh %35 : vector<256x64xf32>
    %cst_18 = arith.constant 1.000000e+00 : f32
    %37 = vector.broadcast %cst_18 : f32 to vector<256x64xf32>
    %38 = arith.addf %37, %36 : vector<256x64xf32>
    %39 = arith.mulf %28, %38 : vector<256x64xf32>
    %40 = arith.truncf %39 : vector<256x64xf32> to vector<256x64xbf16>
    %c0_19 = arith.constant 0 : index
    %c0_20 = arith.constant 0 : index
    %41 = vector.load %arg6[%c0_19, %c0_20] : memref<64x128xbf16, #tpu.memory_space<vmem>>, vector<64x128xbf16>
    %cst_21 = arith.constant dense<0.000000e+00> : vector<256x128xf32>
    %42 = tpu.matmul %40, %41, %cst_21 {dimension_numbers = #tpu.dot_dimension_numbers<[1], [0], [0], [1], [0, 0, 1, 1], [], []>} : vector<256x64xbf16>, vector<64x128xbf16>, vector<256x128xf32> -> vector<256x128xf32>
    %c0_22 = arith.constant 0 : index
    %c0_23 = arith.constant 0 : index
    %43 = vector.load %arg7[%c0_22, %c0_23] : memref<1x128xf32, #tpu.memory_space<vmem>>, vector<1x128xf32>
    %44 = vector.broadcast %43 : vector<1x128xf32> to vector<256x128xf32>
    %45 = arith.addf %42, %44 : vector<256x128xf32>
    %cst_24 = arith.constant 5.000000e-01 : f32
    %46 = vector.broadcast %cst_24 : f32 to vector<256x128xf32>
    %47 = arith.mulf %46, %45 : vector<256x128xf32>
    %cst_25 = arith.constant 4.471500e-02 : f32
    %48 = vector.broadcast %cst_25 : f32 to vector<256x128xf32>
    %49 = arith.mulf %48, %45 : vector<256x128xf32>
    %50 = arith.mulf %49, %45 : vector<256x128xf32>
    %51 = arith.mulf %50, %45 : vector<256x128xf32>
    %52 = arith.addf %45, %51 : vector<256x128xf32>
    %cst_26 = arith.constant 0.797884583 : f32
    %53 = vector.broadcast %cst_26 : f32 to vector<256x128xf32>
    %54 = arith.mulf %53, %52 : vector<256x128xf32>
    %55 = math.tanh %54 : vector<256x128xf32>
    %cst_27 = arith.constant 1.000000e+00 : f32
    %56 = vector.broadcast %cst_27 : f32 to vector<256x128xf32>
    %57 = arith.addf %56, %55 : vector<256x128xf32>
    %58 = arith.mulf %47, %57 : vector<256x128xf32>
    %59 = vector.extract_strided_slice %58 {offsets = [0, 0], sizes = [128, 128], strides = [1, 1]} : vector<256x128xf32> to vector<128x128xf32>
    %60 = vector.extract_strided_slice %58 {offsets = [128, 0], sizes = [128, 128], strides = [1, 1]} : vector<256x128xf32> to vector<128x128xf32>
    %61 = arith.maximumf %59, %60 : vector<128x128xf32>
    %c0_28 = arith.constant 0 : index
    %c0_29 = arith.constant 0 : index
    %62 = vector.load %arg10[%c0_28, %c0_29] : memref<128x128xf32, #tpu.memory_space<vmem>>, vector<128x128xf32>
    tpu.vector_store %arg10[%c0_28, %c0_29], %61 {strides = array<i32>} : memref<128x128xf32, #tpu.memory_space<vmem>>, vector<128x128xf32>,
    %c0_30 = arith.constant 0 : index
    %c0_31 = arith.constant 0 : index
    %63 = vector.load %arg8[%c0_30, %c0_31] : memref<128x128xf32, #tpu.memory_space<vmem>>, vector<128x128xf32>
    %cst_32 = arith.constant dense<0.000000e+00> : vector<128x128xf32>
    %64 = tpu.matmul %61, %63, %cst_32 {dimension_numbers = #tpu.dot_dimension_numbers<[1], [0], [0], [1], [0, 0, 1, 1], [], []>} : vector<128x128xf32>, vector<128x128xf32>, vector<128x128xf32> -> vector<128x128xf32>
    %c0_33 = arith.constant 0 : index
    %c0_34 = arith.constant 0 : index
    %65 = vector.load %arg9[%c0_33, %c0_34] : memref<1x128xf32, #tpu.memory_space<vmem>>, vector<1x128xf32>
    %66 = vector.broadcast %65 : vector<1x128xf32> to vector<128x128xf32>
    %67 = arith.addf %64, %66 : vector<128x128xf32>
    %cst_35 = arith.constant dense<0xFF800000> : vector<128xf32>
    %68 = vector.multi_reduction <maximumf>, %67, %cst_35 [1] : vector<128x128xf32> to vector<128xf32>
    %69 = vector.shape_cast %68 : vector<128xf32> to vector<128x1xf32>
    %70 = vector.broadcast %69 : vector<128x1xf32> to vector<128x128xf32>
    %71 = arith.subf %67, %70 : vector<128x128xf32>
    %72 = math.exp %71 : vector<128x128xf32>
    %cst_36 = arith.constant dense<0.000000e+00> : vector<128xf32>
    %73 = vector.multi_reduction <add>, %72, %cst_36 [1] : vector<128x128xf32> to vector<128xf32>
    %74 = vector.shape_cast %73 : vector<128xf32> to vector<128x1xf32>
    %75 = tpu.reciprocal %74 {approx = true} : vector<128x1xf32> -> vector<128x1xf32>
    %76 = vector.broadcast %75 : vector<128x1xf32> to vector<128x128xf32>
    %77 = arith.mulf %72, %76 : vector<128x128xf32>
    %c0_37 = arith.constant 0 : index
    %c0_38 = arith.constant 0 : index
    %78 = vector.load %arg11[%c0_37, %c0_38] : memref<128x128xf32, #tpu.memory_space<vmem>>, vector<128x128xf32>
    tpu.vector_store %arg11[%c0_37, %c0_38], %77 {strides = array<i32>} : memref<128x128xf32, #tpu.memory_space<vmem>>, vector<128x128xf32>,
    return
  }
  func.func @transform_0(%arg0: i32) -> (i32, i32, i32) {
    %c0_i32 = arith.constant 0 : i32
    %c0_i32_0 = arith.constant 0 : i32
    %c0_i32_1 = arith.constant 0 : i32
    return %c0_i32, %arg0, %c0_i32_0 : i32, i32, i32
  }
  func.func @transform_1(%arg0: i32) -> (i32, i32) {
    %c0_i32 = arith.constant 0 : i32
    %c0_i32_0 = arith.constant 0 : i32
    %c0_i32_1 = arith.constant 0 : i32
    return %c0_i32, %c0_i32_0 : i32, i32
  }
  func.func @transform_2(%arg0: i32) -> (i32, i32) {
    %c0_i32 = arith.constant 0 : i32
    %c0_i32_0 = arith.constant 0 : i32
    %c0_i32_1 = arith.constant 0 : i32
    return %c0_i32, %c0_i32_0 : i32, i32
  }
  func.func @transform_3(%arg0: i32) -> (i32, i32) {
    %c0_i32 = arith.constant 0 : i32
    %c0_i32_0 = arith.constant 0 : i32
    %c0_i32_1 = arith.constant 0 : i32
    return %c0_i32, %c0_i32_0 : i32, i32
  }
  func.func @transform_4(%arg0: i32) -> (i32, i32) {
    %c0_i32 = arith.constant 0 : i32
    %c0_i32_0 = arith.constant 0 : i32
    %c0_i32_1 = arith.constant 0 : i32
    return %c0_i32, %c0_i32_0 : i32, i32
  }
  func.func @transform_5(%arg0: i32) -> (i32, i32) {
    %c0_i32 = arith.constant 0 : i32
    %c0_i32_0 = arith.constant 0 : i32
    %c0_i32_1 = arith.constant 0 : i32
    return %c0_i32, %c0_i32_0 : i32, i32
  }
  func.func @transform_6(%arg0: i32) -> (i32, i32) {
    %c0_i32 = arith.constant 0 : i32
    %c0_i32_0 = arith.constant 0 : i32
    %c0_i32_1 = arith.constant 0 : i32
    return %c0_i32, %c0_i32_0 : i32, i32
  }
  func.func @transform_7(%arg0: i32) -> (i32, i32) {
    %c0_i32 = arith.constant 0 : i32
    %c0_i32_0 = arith.constant 0 : i32
    %c0_i32_1 = arith.constant 0 : i32
    return %c0_i32, %c0_i32_0 : i32, i32
  }
  func.func @transform_8(%arg0: i32) -> (i32, i32) {
    %c0_i32 = arith.constant 0 : i32
    %c0_i32_0 = arith.constant 0 : i32
    %c0_i32_1 = arith.constant 0 : i32
    return %c0_i32, %c0_i32_0 : i32, i32
  }
  func.func @transform_9(%arg0: i32) -> (i32, i32) {
    %c0_i32 = arith.constant 0 : i32
    %c0_i32_0 = arith.constant 0 : i32
    return %arg0, %c0_i32 : i32, i32
  }
  func.func @transform_10(%arg0: i32) -> (i32, i32) {
    %c0_i32 = arith.constant 0 : i32
    %c0_i32_0 = arith.constant 0 : i32
    return %arg0, %c0_i32 : i32, i32
  }
}

</mosaic_0001>

<bundles_post_ra>
// kernel: tpu_custom_call.1
= control target key start
LH: loop header
LB: loop body
LE: loop exit
PB: predicated region body
PF: predicated region fallthrough
CT: control target
= control target key end

     0   :  { %s3913_s0 = inlined_call_operand.vmem [shape: f32[2,256,32], index: 0, kind: input, shape index: {}]   ;;  %s3914_s1 = inlined_call_operand.vmem [shape: bf16[32,64], index: 1, kind: input, shape index: {}]   ;;  %s3915_s2 = inlined_call_operand.vmem [shape: f32[1,64], index: 2, kind: input, shape index: {}]   ;;  %s3916_s3 = inlined_call_operand.vmem [shape: bf16[64,64], index: 3, kind: input, shape index: {}]   ;;  %s3917_s4 = inlined_call_operand.vmem [shape: f32[1,64], index: 4, kind: input, shape index: {}]   ;;  %s3918_s5 = inlined_call_operand.vmem [shape: bf16[64,128], index: 5, kind: input, shape index: {}]   ;;  %s3919_s6 = inlined_call_operand.vmem [shape: f32[1,128], index: 6, kind: input, shape index: {}]   ;;  %s3920_s7 = inlined_call_operand.vmem [shape: f32[128,128], index: 7, kind: input, shape index: {}]   ;;  %s3921_s8 = inlined_call_operand.vmem [shape: f32[1,128], index: 8, kind: input, shape index: {}]   ;;  %s3922_s9 = inlined_call_operand.hbm [shape: f32[256,128], index: 9, kind: output, shape index: {0}]   ;;  %s3923_s10 = inlined_call_operand.hbm [shape: f32[256,128], index: 10, kind: output, shape index: {1}]  }
   0x1   :  { %3924 = sst [smem:[#allocation9_spill]] %s3913_s0 }
   0x2   :  { %3925 = sst [smem:[#allocation10_spill]] %s3914_s1 }
   0x3   :  { %3926 = sst [smem:[#allocation11_spill]] %s3915_s2 }
   0x4   :  { %16 = vsyncpa [#allocation4], 0 }
   0x5   :  { %18 = vsyncpa [#allocation4 + $0x1], 0 }
   0x6   :  { %19 = vsyncpa [#allocation6], 0 }
   0x7   :  { %21 = vsyncpa [#allocation6 + $0x1], 0  ;;  %s2988_s13 = smov 0   ;;  %s2990_s14 = smov 0  }
   0x8   :  { %s2992_s15 = smov 0   ;;  %s2994_s16 = smov 0  }
   0x9 LB: > { %s2397_s17 = sadd.s32 4294967295, %s2929_s16   ;;  %s2398_s18 = sadd.s32 4294967294, %s2929_s16   ;;  %s2929_s16 = sphi %s2994_s16, %s3935_s16   ;;  %s2925_s15 = sphi %s2992_s15, %s3934_s15   ;;  %s2921_s14 = sphi %s2990_s14, %s3933_s14   ;;  %s2917_s13 = sphi %s2988_s13, %s3932_s13  }
   0xa   : > { %s3011_s19 = sadd.s32 1, %s2929_s16   ;;  %s34_s20 = sadd.s32 1, %s2925_s15 }
   0xb   : > { %s31_s21 = ssub.s32 %s2929_s16, %s3011_s19  ;;  %p41_p0 = scmp.ne.s32.totalorder %s2925_s15, %s2921_s14 }
   0xc   : > { %p32_p1 = scmp.eq.s32.totalorder %s31_s21, 0  ;;  %p42_p2 = scmp.eq.s32.totalorder %s2929_s16, 0 }
   0xd   : > { %p239_p3 = scmp.eq.s32.totalorder %s2397_s17, 1  ;;  %p244_p4 = scmp.ne.s32.totalorder %s2921_s14, %s2917_s13 }
   0xe   : > { %s3024_s22 = scalar_select %p32_p1, %s2925_s15, %s34_s20  }
   0xf   : > { %p43_p5 = por %p42_p2, %p41_p0  ;;  %p3026_p6 = por %p239_p3, %p41_p0 }
  0x10   : > { %p245_p7 = scmp.eq.s32.totalorder %s2398_s18, 1  ;;  %p2400_p9 = scmp.ge.s32.totalorder %s2929_s16, 2 }
  0x12   : > { %p3030_p8 = por %p245_p7, %p244_p4  ;;  %311 = sbr.rel (%p2400_p9) target bundleno = 65 (0x41), region = 48 }
  0x17   : > { %314 = sbr.rel (!%p43_p5) target bundleno = 65 (0x41), region = 52  ;;  %s316_s25 = sand.u32 (%p43_p5), 1, %s2925_s15  }
  0x18   : > { %s2504_s26 = sshll.u32 (%p43_p5), %s2929_s16, 7  ;;  %s2401_s27 = sshll.u32 (%p43_p5), %s316_s25, 8 }
  0x19   : > { %s3929_s0 = sld [smem:[#allocation9_spill]] (%p43_p5)  ;;  %s3047_s11 = scalar_lea.vmem (%p43_p5), [#allocation2], %s2401_s27 }
  0x1f   : > { %s3042_s30 = scalar_lea.vmem %s3929_s0, %s2504_s26 }
  0x20   : > { %v412_v0 = vld [vmem:[%s3042_s30] sm:$0xff]  ;;  %v414_v1 = vld [vmem:[%s3042_s30 + $0x8] sm:$0xff]  ;;  %v416_v2 = vld [vmem:[%s3042_s30 + $0x10] sm:$0xff] }
  0x21   : > { %413 = vst [vmem:[%s3047_s11] sm:$0xff] %v412_v0  ;;  %v418_v3 = vld [vmem:[%s3042_s30 + $0x18] sm:$0xff]  ;;  %v420_v4 = vld [vmem:[%s3042_s30 + $0x20] sm:$0xff]  ;;  %v422_v5 = vld [vmem:[%s3042_s30 + $0x28] sm:$0xff] }
  0x22   : > { %415 = vst [vmem:[%s3047_s11 + $0x8] sm:$0xff] %v414_v1  ;;  %v424_v6 = vld [vmem:[%s3042_s30 + $0x30] sm:$0xff]  ;;  %v426_v7 = vld [vmem:[%s3042_s30 + $0x38] sm:$0xff]  ;;  %v428_v8 = vld [vmem:[%s3042_s30 + $0x40] sm:$0xff] }
  0x23   : > { %417 = vst [vmem:[%s3047_s11 + $0x10] sm:$0xff] %v416_v2  ;;  %v430_v9 = vld [vmem:[%s3042_s30 + $0x48] sm:$0xff]  ;;  %v432_v10 = vld [vmem:[%s3042_s30 + $0x50] sm:$0xff]  ;;  %v434_v11 = vld [vmem:[%s3042_s30 + $0x58] sm:$0xff] }
  0x24   : > { %419 = vst [vmem:[%s3047_s11 + $0x18] sm:$0xff] %v418_v3  ;;  %v436_v12 = vld [vmem:[%s3042_s30 + $0x60] sm:$0xff]  ;;  %v438_v13 = vld [vmem:[%s3042_s30 + $0x68] sm:$0xff]  ;;  %v440_v14 = vld [vmem:[%s3042_s30 + $0x70] sm:$0xff] }
  0x25   : > { %421 = vst [vmem:[%s3047_s11 + $0x20] sm:$0xff] %v420_v4  ;;  %v442_v15 = vld [vmem:[%s3042_s30 + $0x78] sm:$0xff]  ;;  %v444_v16 = vld [vmem:[%s3042_s30 + $0x100] sm:$0xff]  ;;  %v446_v17 = vld [vmem:[%s3042_s30 + $0x108] sm:$0xff] }
  0x26   : > { %423 = vst [vmem:[%s3047_s11 + $0x28] sm:$0xff] %v422_v5  ;;  %v448_v18 = vld [vmem:[%s3042_s30 + $0x110] sm:$0xff]  ;;  %v450_v19 = vld [vmem:[%s3042_s30 + $0x118] sm:$0xff]  ;;  %v452_v20 = vld [vmem:[%s3042_s30 + $0x120] sm:$0xff] }
  0x27   : > { %425 = vst [vmem:[%s3047_s11 + $0x30] sm:$0xff] %v424_v6  ;;  %v454_v21 = vld [vmem:[%s3042_s30 + $0x128] sm:$0xff]  ;;  %v456_v22 = vld [vmem:[%s3042_s30 + $0x130] sm:$0xff]  ;;  %v458_v23 = vld [vmem:[%s3042_s30 + $0x138] sm:$0xff] }
  0x28   : > { %427 = vst [vmem:[%s3047_s11 + $0x38] sm:$0xff] %v426_v7  ;;  %v460_v24 = vld [vmem:[%s3042_s30 + $0x140] sm:$0xff]  ;;  %v462_v25 = vld [vmem:[%s3042_s30 + $0x148] sm:$0xff]  ;;  %v464_v26 = vld [vmem:[%s3042_s30 + $0x150] sm:$0xff] }
  0x29   : > { %429 = vst [vmem:[%s3047_s11 + $0x40] sm:$0xff] %v428_v8  ;;  %v466_v27 = vld [vmem:[%s3042_s30 + $0x158] sm:$0xff]  ;;  %v468_v28 = vld [vmem:[%s3042_s30 + $0x160] sm:$0xff]  ;;  %v470_v29 = vld [vmem:[%s3042_s30 + $0x168] sm:$0xff] }
  0x2a   : > { %431 = vst [vmem:[%s3047_s11 + $0x48] sm:$0xff] %v430_v9  ;;  %v472_v30 = vld [vmem:[%s3042_s30 + $0x170] sm:$0xff]  ;;  %v474_v31 = vld [vmem:[%s3042_s30 + $0x178] sm:$0xff] }
  0x2b   : > { %433 = vst [vmem:[%s3047_s11 + $0x50] sm:$0xff] %v432_v10 }
  0x2c   : > { %435 = vst [vmem:[%s3047_s11 + $0x58] sm:$0xff] %v434_v11 }
  0x2d   : > { %437 = vst [vmem:[%s3047_s11 + $0x60] sm:$0xff] %v436_v12 }
  0x2e   : > { %439 = vst [vmem:[%s3047_s11 + $0x68] sm:$0xff] %v438_v13 }
  0x2f   : > { %441 = vst [vmem:[%s3047_s11 + $0x70] sm:$0xff] %v440_v14 }
  0x30   : > { %443 = vst [vmem:[%s3047_s11 + $0x78] sm:$0xff] %v442_v15 }
  0x31   : > { %445 = vst [vmem:[%s3047_s11 + $0x80] sm:$0xff] %v444_v16 }
  0x32   : > { %447 = vst [vmem:[%s3047_s11 + $0x88] sm:$0xff] %v446_v17 }
  0x33   : > { %449 = vst [vmem:[%s3047_s11 + $0x90] sm:$0xff] %v448_v18 }
  0x34   : > { %451 = vst [vmem:[%s3047_s11 + $0x98] sm:$0xff] %v450_v19 }
  0x35   : > { %453 = vst [vmem:[%s3047_s11 + $0xa0] sm:$0xff] %v452_v20 }
  0x36   : > { %455 = vst [vmem:[%s3047_s11 + $0xa8] sm:$0xff] %v454_v21 }
  0x37   : > { %457 = vst [vmem:[%s3047_s11 + $0xb0] sm:$0xff] %v456_v22 }
  0x38   : > { %459 = vst [vmem:[%s3047_s11 + $0xb8] sm:$0xff] %v458_v23 }
  0x39   : > { %461 = vst [vmem:[%s3047_s11 + $0xc0] sm:$0xff] %v460_v24 }
  0x3a   : > { %463 = vst [vmem:[%s3047_s11 + $0xc8] sm:$0xff] %v462_v25 }
  0x3b   : > { %465 = vst [vmem:[%s3047_s11 + $0xd0] sm:$0xff] %v464_v26 }
  0x3c   : > { %467 = vst [vmem:[%s3047_s11 + $0xd8] sm:$0xff] %v466_v27 }
  0x3d   : > { %469 = vst [vmem:[%s3047_s11 + $0xe0] sm:$0xff] %v468_v28 }
  0x3e   : > { %471 = vst [vmem:[%s3047_s11 + $0xe8] sm:$0xff] %v470_v29 }
  0x3f   : > { %473 = vst [vmem:[%s3047_s11 + $0xf0] sm:$0xff] %v472_v30 }
  0x40   : > { %475 = vst [vmem:[%s3047_s11 + $0xf8] sm:$0xff] %v474_v31 }
  0x41 PF: > { %p2404_p10 = scmp.ge.s32.totalorder %s2929_s16, 1  ;;  %p480_p11 = scmp.lt.s32.totalorder %s2929_s16, 3 }
  0x43   : > { %p481_p12 = pnand %p2404_p10, %p480_p11 }
  0x44   : > { %s3930_s1 = sld [smem:[#allocation10_spill]] (!%p481_p12)  ;;  %s3116_s20 = sand.u32 (!%p481_p12), 1, %s2921_s14  }
  0x45   : > { %484 = sbr.rel (%p481_p12) target bundleno = 1200 (0x4b0), region = 90  ;;  %s2405_s21 = sshll.u32 (!%p481_p12), %s3116_s20, 8 }
  0x46   : > { %s3122_s27 = scalar_lea.vmem (!%p481_p12), [#allocation2], %s2405_s21  ;;  %s3931_s2 = sld [smem:[#allocation11_spill]] (!%p481_p12) }
  0x47   : > { %s2406_s26 = sshll.u32 (!%p481_p12), %s3116_s20, 7  ;;  %s3816_s30 = sshll.u32 (!%p481_p12), %s2397_s17, 7 }
  0x48   : > { %s3586_s28 = scalar_lea.vmem (!%p481_p12), [#allocation3], %s2406_s26  ;;  %s2276_s18 = scalar_lea.hbm (!%p481_p12), %s3922_s9, %s3816_s30 }
  0x49   : > { %s2277_s21 = sshll.u32 (!%p481_p12), %s3586_s28, 4  ;;  %s2279_s25 = sshll.u32 (!%p481_p12), %s2276_s18, 4  ;;  %s2278_s21 = int_to_ptr.vmem [resolvable:$true] %s2277_s21  ;;  %s2280_s25 = int_to_ptr.hbm [resolvable:$true] %s2279_s25 }
  0x4a   : > { %v2506_v32 = vld [vmem:[%s3930_s1 + $0x8] sm:$0xff]  ;;  %v2505_v33 = vld [vmem:[%s3930_s1] sm:$0xff]  ;;  %vm601_vm0 = vcmask 261120   ;;  %v535_v37 = vld [vmem:[%s3122_s27 + $0x10] sm:$0xff]  ;;  %vm1079_vm1 = vcmask 523264   ;;  %s2260_s17 = scalar_lea.sflag [#allocation4], %s3116_s20 }
  0x4b   : > { %656 = vmatpush.bf16.msra.mxu0 %v2506_v32  ;;  %2517 = vmatpush.bf16.msra.mxu3 %v2506_v32  ;;  %v533_v34 = vld [vmem:[%s3122_s27] sm:$0xff]  ;;  %v534_v35 = vld [vmem:[%s3122_s27 + $0x8] sm:$0xff]  ;;  %v536_v38 = vld [vmem:[%s3122_s27 + $0x18] sm:$0xff]  ;;  %s2849_s29 = sshra.s32 %s2280_s25, 4  ;;  %s2855_s18 = scalar_lea.hbm %s3922_s9, 256  ;;  %s2850_s29 = int_to_ptr.hbm [resolvable:$true] %s2849_s29 }
  0x4c   : > { %v565_v36 = vpack.c.bf16 %v534_v35, %v533_v34  ;;  %v566_v39 = vpack.c.bf16 %v536_v38, %v535_v37  ;;  %v537_v40 = vld [vmem:[%s3122_s27 + $0x20] sm:$0xff]  ;;  %v538_v41 = vld [vmem:[%s3122_s27 + $0x28] sm:$0xff]  ;;  %v539_v43 = vld [vmem:[%s3122_s27 + $0x30] sm:$0xff]  ;;  %s2851_s11 = scalar_lea.hbm %s2850_s29, 128  ;;  %p2856_p2 = scmp.lt.s32.totalorder %s2850_s29, %s3922_s9 }
  0x4d   : > { %v567_v42 = vpack.c.bf16 %v538_v41, %v537_v40  ;;  %v540_v44 = vld [vmem:[%s3122_s27 + $0x38] sm:$0xff]  ;;  %v541_v46 = vld [vmem:[%s3122_s27 + $0x40] sm:$0xff]  ;;  %v542_v47 = vld [vmem:[%s3122_s27 + $0x48] sm:$0xff]  ;;  %p2852_p13 = scmp.ne.s32.totalorder %s2850_s29, %s2851_s11  ;;  %p2857_p3 = scmp.lt.s32.totalorder %s2855_s18, %s2851_s11 }
  0x4e   : > { %v568_v45 = vpack.c.bf16 %v540_v44, %v539_v43  ;;  %v569_v48 = vpack.c.bf16 %v542_v47, %v541_v46  ;;  %v543_v49 = vld [vmem:[%s3122_s27 + $0x50] sm:$0xff]  ;;  %v544_v50 = vld [vmem:[%s3122_s27 + $0x58] sm:$0xff]  ;;  %v545_v52 = vld [vmem:[%s3122_s27 + $0x60] sm:$0xff] }
  0x4f   : > { %657 = vmatpush.bf16.msra.mxu0 %v2505_v33  ;;  %2518 = vmatpush.bf16.msra.mxu3 %v2505_v33  ;;  %v570_v51 = vpack.c.bf16 %v544_v50, %v543_v49  ;;  %v546_v53 = vld [vmem:[%s3122_s27 + $0x68] sm:$0xff]  ;;  %v547_v55 = vld [vmem:[%s3122_s27 + $0x70] sm:$0xff]  ;;  %v548_v56 = vld [vmem:[%s3122_s27 + $0x78] sm:$0xff]  ;;  %p2853_p0 = pnand %p2852_p13, %p3026_p6  ;;  %p2858_p4 = por %p2857_p3, %p2856_p2 }
  0x50   : > { %v571_v54 = vpack.c.bf16 %v546_v53, %v545_v52  ;;  %v572_v57 = vpack.c.bf16 %v548_v56, %v547_v55  ;;  %v2510_v58 = vld [vmem:[%s3916_s3 + $0x18] sm:$0xff]  ;;  %v2509_v59 = vld [vmem:[%s3916_s3 + $0x10] sm:$0xff]  ;;  %v2508_v60 = vld [vmem:[%s3916_s3 + $0x8] sm:$0xff] }
  0x51   : > { %1132 = vmatpush.bf16.msra.mxu1 %v2510_v58  ;;  %v549_v61 = vld [vmem:[%s3122_s27 + $0x80] sm:$0xff]  ;;  %v550_v62 = vld [vmem:[%s3122_s27 + $0x88] sm:$0xff]  ;;  %v551_v11 = vld [vmem:[%s3122_s27 + $0x90] sm:$0xff]  ;;  %p2854_p1 = pneg %p2853_p0 }
  0x52   : > { %2416 = vmatmul.msk.bf16.vlgmr.msra.gmra.mxu0 %vm601_vm0, %v565_v36  ;;  %v3162_v63 = vld [vmem:[%s3931_s2] ss:$0 sm:$0xff]  ;;  %v573_v1 = vpack.c.bf16 %v550_v62, %v549_v61  ;;  %v552_v12 = vld [vmem:[%s3122_s27 + $0x98] sm:$0xff]  ;;  %v554_v35 = vld [vmem:[%s3122_s27 + $0xa8] sm:$0xff] }
  0x53   : > { %2519 = vmatpush.bf16.msrb.mxu3 %v2510_v58  ;;  %v2507_v0 = vld [vmem:[%s3916_s3] sm:$0xff]  ;;  %v574_v15 = vpack.c.bf16 %v552_v12, %v551_v11  ;;  %v556_v61 = vld [vmem:[%s3122_s27 + $0xb8] sm:$0xff]  ;;  %p2859_p5 = pnand %p2858_p4, %p2854_p1 }
  0x54   : > { %v553_v34 = vld [vmem:[%s3122_s27 + $0xa0] sm:$0xff] }
  0x55   : > { %1133 = vmatpush.bf16.msra.mxu1 %v2509_v59  ;;  %v575_v40 = vpack.c.bf16 %v554_v35, %v553_v34 }
  0x57   : > { %2520 = vmatpush.bf16.msrb.mxu3 %v2509_v59 }
  0x59   : > { %1134 = vmatpush.bf16.msra.mxu1 %v2508_v60 }
  0x5b   : > { %2521 = vmatpush.bf16.msrb.mxu3 %v2508_v60  ;;  %v555_v60 = vld [vmem:[%s3122_s27 + $0xb0] sm:$0xff] }
  0x5d   : > { %1135 = vmatpush.bf16.msra.mxu1 %v2507_v0 }
  0x5f   : > { %2522 = vmatpush.bf16.msrb.mxu3 %v2507_v0 }
  0x62   : > { %2417 = vmatmul.msk.bf16.gmra.mxu0 %vm601_vm0, %v566_v39 }
  0x72   : > { %2418 = vmatmul.msk.bf16.gmra.mxu0 %vm601_vm0, %v567_v42 }
  0x82   : > { %2419 = vmatmul.msk.bf16.gmra.mxu0 %vm601_vm0, %v568_v45 }
  0x92   : > { %2420 = vmatmul.msk.bf16.gmra.mxu0 %vm601_vm0, %v569_v48 }
  0xa2   : > { %2421 = vmatmul.msk.bf16.gmra.mxu0 %vm601_vm0, %v570_v51 }
  0xb2   : > { %2422 = vmatmul.msk.bf16.gmra.mxu0 %vm601_vm0, %v571_v54 }
  0xc2   : > { %2423 = vmatmul.msk.bf16.gmra.mxu0 %vm601_vm0, %v572_v57 }
  0xcf   : > { %v659_v2 = vpop.f32.mrf.mxu0 }
  0xd0   : > { %v660_v3 = vadd.f32 %v3162_v63, %v659_v2 }
  0xd2   : > { %v771_v4 = vmul.f32 0.044715, %v660_v3  ;;  %2424 = vmatmul.msk.bf16.gmra.mxu0 %vm601_vm0, %v573_v1  ;;  %v739_v31 = vmul.f32 0.5, %v660_v3 }
  0xd4   : > { %v803_v5 = vmul.f32 %v771_v4, %v660_v3 }
  0xd6   : > { %v835_v6 = vmul.f32 %v803_v5, %v660_v3 }
  0xd7   : > { %v661_v7 = vpop.f32.mrf.mxu0 }
  0xd8   : > { %v662_v8 = vadd.f32 %v3162_v63, %v661_v7  ;;  %v867_v9 = vadd.f32 %v835_v6, %v660_v3  ;;  %v576_v3 = vpack.c.bf16 %v556_v61, %v555_v60 }
  0xda   : > { %v772_v10 = vmul.f32 0.044715, %v662_v8  ;;  %v899_v14 = vmul.f32 0.7978846, %v867_v9  ;;  %v740_v32 = vmul.f32 0.5, %v662_v8  ;;  %v563_v9 = vld [vmem:[%s3122_s27 + $0xf0] sm:$0xff] }
  0xdc   : > { %v804_v13 = vmul.f32 %v772_v10, %v662_v8  ;;  %2577 = vtanh.f32 %v899_v14  ;;  %v564_v10 = vld [vmem:[%s3122_s27 + $0xf8] sm:$0xff] }
  0xdd   : > { %v580_v11 = vpack.c.bf16 %v564_v10, %v563_v9 }
  0xde   : > { %v836_v16 = vmul.f32 %v804_v13, %v662_v8 }
  0xdf   : > { %v664_v17 = vpop.f32.mrf.mxu0  ;;  %2431 = vmatmul.msk.bf16.vlgmr.msra.gmra.mxu3 %vm601_vm0, %v580_v11 }
  0xe0   : > { %v665_v18 = vadd.f32 %v3162_v63, %v664_v17  ;;  %v868_v19 = vadd.f32 %v836_v16, %v662_v8 }
  0xe2   : > { %v773_v20 = vmul.f32 0.044715, %v665_v18  ;;  %2425 = vmatmul.msk.bf16.gmra.mxu0 %vm601_vm0, %v574_v15  ;;  %v900_v21 = vmul.f32 0.7978846, %v868_v19  ;;  %v2578_v23 = vpop.eup %2577  ;;  %v741_v57 = vmul.f32 0.5, %v665_v18 }
  0xe3   : > { %v963_v28 = vadd.f32 1.0, %v2578_v23 }
  0xe4   : > { %v805_v22 = vmul.f32 %v773_v20, %v665_v18  ;;  %2579 = vtanh.f32 %v900_v21 }
  0xe5   : > { %v995_v38 = vmul.f32 %v963_v28, %v739_v31 }
  0xe6   : > { %v837_v24 = vmul.f32 %v805_v22, %v665_v18 }
  0xe7   : > { %v666_v25 = vpop.f32.mrf.mxu0 }
  0xe8   : > { %v667_v26 = vadd.f32 %v3162_v63, %v666_v25  ;;  %v869_v27 = vadd.f32 %v837_v24, %v665_v18 }
  0xea   : > { %v2580_v29 = vpop.eup %2579  ;;  %v774_v30 = vmul.f32 0.044715, %v667_v26  ;;  %v901_v37 = vmul.f32 0.7978846, %v869_v27  ;;  %v742_v58 = vmul.f32 0.5, %v667_v26  ;;  %v558_v27 = vld [vmem:[%s3122_s27 + $0xc8] sm:$0xff] }
  0xeb   : > { %v964_v33 = vadd.f32 1.0, %v2580_v29 }
  0xec   : > { %v806_v36 = vmul.f32 %v774_v30, %v667_v26  ;;  %2581 = vtanh.f32 %v901_v37 }
  0xed   : > { %v996_v39 = vmul.f32 %v964_v33, %v740_v32 }
  0xee   : > { %v838_v41 = vmul.f32 %v806_v36, %v667_v26 }
  0xef   : > { %v669_v42 = vpop.f32.mrf.mxu0  ;;  %v1027_v43 = vpack.c.bf16 %v996_v39, %v995_v38 }
  0xf0   : > { %v670_v44 = vadd.f32 %v3162_v63, %v669_v42  ;;  %v870_v45 = vadd.f32 %v838_v41, %v667_v26  ;;  %v557_v26 = vld [vmem:[%s3122_s27 + $0xc0] sm:$0xff] }
  0xf1   : > { %2448 = vmatmul.msk.bf16.vlgmr.msra.gmra.mxu1 %vm1079_vm1, %v1027_v43  ;;  %v577_v32 = vpack.c.bf16 %v558_v27, %v557_v26 }
  0xf2   : > { %v775_v46 = vmul.f32 0.044715, %v670_v44  ;;  %2426 = vmatmul.msk.bf16.gmra.mxu0 %vm601_vm0, %v575_v40  ;;  %v902_v47 = vmul.f32 0.7978846, %v870_v45  ;;  %v2582_v49 = vpop.eup %2581  ;;  %v743_v23 = vmul.f32 0.5, %v670_v44 }
  0xf3   : > { %v965_v54 = vadd.f32 1.0, %v2582_v49 }
  0xf4   : > { %v807_v48 = vmul.f32 %v775_v46, %v670_v44  ;;  %2583 = vtanh.f32 %v902_v47 }
  0xf5   : > { %v997_v1 = vmul.f32 %v965_v54, %v741_v57 }
  0xf6   : > { %v839_v50 = vmul.f32 %v807_v48, %v670_v44 }
  0xf7   : > { %v671_v51 = vpop.f32.mrf.mxu0 }
  0xf8   : > { %v672_v52 = vadd.f32 %v3162_v63, %v671_v51  ;;  %v871_v53 = vadd.f32 %v839_v50, %v670_v44 }
  0xfa   : > { %v2584_v55 = vpop.eup %2583  ;;  %v776_v56 = vmul.f32 0.044715, %v672_v52  ;;  %v903_v0 = vmul.f32 0.7978846, %v871_v53  ;;  %v744_v24 = vmul.f32 0.5, %v672_v52  ;;  %v560_v53 = vld [vmem:[%s3122_s27 + $0xd8] sm:$0xff] }
  0xfb   : > { %v966_v59 = vadd.f32 1.0, %v2584_v55 }
  0xfc   : > { %v808_v62 = vmul.f32 %v776_v56, %v672_v52  ;;  %2585 = vtanh.f32 %v903_v0 }
  0xfd   : > { %v998_v2 = vmul.f32 %v966_v59, %v742_v58 }
  0xfe   : > { %v840_v4 = vmul.f32 %v808_v62, %v672_v52 }
  0xff   : > { %v674_v5 = vpop.f32.mrf.mxu0  ;;  %v1028_v6 = vpack.c.bf16 %v998_v2, %v997_v1 }
 0x100   : > { %v675_v7 = vadd.f32 %v3162_v63, %v674_v5  ;;  %v872_v8 = vadd.f32 %v840_v4, %v672_v52  ;;  %v559_v52 = vld [vmem:[%s3122_s27 + $0xd0] sm:$0xff] }
 0x101   : > { %2449 = vmatmul.msk.bf16.gmra.mxu1 %vm1079_vm1, %v1028_v6  ;;  %v578_v58 = vpack.c.bf16 %v560_v53, %v559_v52 }
 0x102   : > { %v777_v12 = vmul.f32 0.044715, %v675_v7  ;;  %2427 = vmatmul.msk.bf16.gmra.mxu0 %vm601_vm0, %v576_v3  ;;  %v904_v13 = vmul.f32 0.7978846, %v872_v8  ;;  %v2586_v15 = vpop.eup %2585  ;;  %v745_v49 = vmul.f32 0.5, %v675_v7 }
 0x103   : > { %v967_v20 = vadd.f32 1.0, %v2586_v15  ;;  %v561_v15 = vld [vmem:[%s3122_s27 + $0xe0] sm:$0xff] }
 0x104   : > { %v809_v14 = vmul.f32 %v777_v12, %v675_v7  ;;  %2587 = vtanh.f32 %v904_v13 }
 0x105   : > { %v999_v30 = vmul.f32 %v967_v20, %v743_v23 }
 0x106   : > { %v841_v16 = vmul.f32 %v809_v14, %v675_v7 }
 0x107   : > { %v676_v17 = vpop.f32.mrf.mxu0 }
 0x108   : > { %v677_v18 = vadd.f32 %v3162_v63, %v676_v17  ;;  %v873_v19 = vadd.f32 %v841_v16, %v675_v7  ;;  %v562_v16 = vld [vmem:[%s3122_s27 + $0xe8] sm:$0xff]  ;;  %s3828_s27 = scalar_lea.vmem [#allocation5], %s2406_s26 }
 0x10a   : > { %v2588_v21 = vpop.eup %2587  ;;  %v778_v22 = vmul.f32 0.044715, %v677_v18  ;;  %v905_v29 = vmul.f32 0.7978846, %v873_v19  ;;  %v746_v50 = vmul.f32 0.5, %v677_v18 }
 0x10b   : > { %v968_v25 = vadd.f32 1.0, %v2588_v21  ;;  %v579_v21 = vpack.c.bf16 %v562_v16, %v561_v15 }
 0x10c   : > { %v810_v28 = vmul.f32 %v778_v22, %v677_v18  ;;  %2589 = vtanh.f32 %v905_v29 }
 0x10d   : > { %v1000_v31 = vmul.f32 %v968_v25, %v744_v24 }
 0x10e   : > { %v842_v33 = vmul.f32 %v810_v28, %v677_v18 }
 0x10f   : > { %v679_v34 = vpop.f32.mrf.mxu0  ;;  %v1029_v35 = vpack.c.bf16 %v1000_v31, %v999_v30 }
 0x110   : > { %v680_v36 = vadd.f32 %v3162_v63, %v679_v34  ;;  %v874_v37 = vadd.f32 %v842_v33, %v677_v18 }
 0x111   : > { %2450 = vmatmul.msk.bf16.gmra.mxu1 %vm1079_vm1, %v1029_v35 }
 0x112   : > { %v779_v38 = vmul.f32 0.044715, %v680_v36  ;;  %2428 = vmatmul.msk.bf16.gmra.mxu0 %vm601_vm0, %v577_v32  ;;  %v906_v39 = vmul.f32 0.7978846, %v874_v37  ;;  %v2590_v41 = vpop.eup %2589  ;;  %v747_v12 = vmul.f32 0.5, %v680_v36 }
 0x113   : > { %v969_v46 = vadd.f32 1.0, %v2590_v41 }
 0x114   : > { %v811_v40 = vmul.f32 %v779_v38, %v680_v36  ;;  %2591 = vtanh.f32 %v906_v39 }
 0x115   : > { %v1001_v56 = vmul.f32 %v969_v46, %v745_v49 }
 0x116   : > { %v843_v42 = vmul.f32 %v811_v40, %v680_v36 }
 0x117   : > { %v681_v43 = vpop.f32.mrf.mxu0 }
 0x118   : > { %v682_v44 = vadd.f32 %v3162_v63, %v681_v43  ;;  %v875_v45 = vadd.f32 %v843_v42, %v680_v36 }
 0x11a   : > { %v2592_v47 = vpop.eup %2591  ;;  %v780_v48 = vmul.f32 0.044715, %v682_v44  ;;  %v907_v55 = vmul.f32 0.7978846, %v875_v45  ;;  %v748_v13 = vmul.f32 0.5, %v682_v44 }
 0x11b   : > { %v970_v51 = vadd.f32 1.0, %v2592_v47 }
 0x11c   : > { %v812_v54 = vmul.f32 %v780_v48, %v682_v44  ;;  %2593 = vtanh.f32 %v907_v55 }
 0x11d   : > { %v1002_v57 = vmul.f32 %v970_v51, %v746_v50 }
 0x11e   : > { %v844_v59 = vmul.f32 %v812_v54, %v682_v44 }
 0x11f   : > { %v684_v60 = vpop.f32.mrf.mxu0  ;;  %v1030_v61 = vpack.c.bf16 %v1002_v57, %v1001_v56 }
 0x120   : > { %v685_v62 = vadd.f32 %v3162_v63, %v684_v60  ;;  %v876_v0 = vadd.f32 %v844_v59, %v682_v44 }
 0x121   : > { %2451 = vmatmul.msk.bf16.gmra.mxu1 %vm1079_vm1, %v1030_v61 }
 0x122   : > { %v781_v1 = vmul.f32 0.044715, %v685_v62  ;;  %2429 = vmatmul.msk.bf16.gmra.mxu0 %vm601_vm0, %v578_v58  ;;  %v908_v2 = vmul.f32 0.7978846, %v876_v0  ;;  %v2594_v4 = vpop.eup %2593  ;;  %v749_v38 = vmul.f32 0.5, %v685_v62 }
 0x123   : > { %v971_v9 = vadd.f32 1.0, %v2594_v4 }
 0x124   : > { %v813_v3 = vmul.f32 %v781_v1, %v685_v62  ;;  %2595 = vtanh.f32 %v908_v2 }
 0x125   : > { %v1003_v19 = vmul.f32 %v971_v9, %v747_v12 }
 0x126   : > { %v845_v5 = vmul.f32 %v813_v3, %v685_v62 }
 0x127   : > { %v686_v6 = vpop.f32.mrf.mxu0 }
 0x128   : > { %v687_v7 = vadd.f32 %v3162_v63, %v686_v6  ;;  %v877_v8 = vadd.f32 %v845_v5, %v685_v62 }
 0x12a   : > { %v2596_v10 = vpop.eup %2595  ;;  %v782_v11 = vmul.f32 0.044715, %v687_v7  ;;  %v909_v18 = vmul.f32 0.7978846, %v877_v8  ;;  %v750_v39 = vmul.f32 0.5, %v687_v7 }
 0x12b   : > { %v972_v14 = vadd.f32 1.0, %v2596_v10 }
 0x12c   : > { %v814_v17 = vmul.f32 %v782_v11, %v687_v7  ;;  %2597 = vtanh.f32 %v909_v18 }
 0x12d   : > { %v1004_v20 = vmul.f32 %v972_v14, %v748_v13 }
 0x12e   : > { %v846_v22 = vmul.f32 %v814_v17, %v687_v7 }
 0x12f   : > { %v689_v23 = vpop.f32.mrf.mxu0  ;;  %v1031_v24 = vpack.c.bf16 %v1004_v20, %v1003_v19 }
 0x130   : > { %v690_v25 = vadd.f32 %v3162_v63, %v689_v23  ;;  %v878_v26 = vadd.f32 %v846_v22, %v687_v7 }
 0x131   : > { %2452 = vmatmul.msk.bf16.gmra.mxu1 %vm1079_vm1, %v1031_v24 }
 0x132   : > { %v783_v27 = vmul.f32 0.044715, %v690_v25  ;;  %2430 = vmatmul.msk.bf16.gmra.mxu0 %vm601_vm0, %v579_v21  ;;  %v910_v28 = vmul.f32 0.7978846, %v878_v26  ;;  %v2598_v30 = vpop.eup %2597  ;;  %v751_v61 = vmul.f32 0.5, %v690_v25 }
 0x133   : > { %v973_v35 = vadd.f32 1.0, %v2598_v30 }
 0x134   : > { %v815_v29 = vmul.f32 %v783_v27, %v690_v25  ;;  %2599 = vtanh.f32 %v910_v28 }
 0x135   : > { %v1005_v43 = vmul.f32 %v973_v35, %v749_v38 }
 0x136   : > { %v847_v31 = vmul.f32 %v815_v29, %v690_v25 }
 0x137   : > { %v691_v32 = vpop.f32.mrf.mxu0 }
 0x138   : > { %v692_v33 = vadd.f32 %v3162_v63, %v691_v32  ;;  %v879_v34 = vadd.f32 %v847_v31, %v690_v25  ;;  %v2514_v31 = vld [vmem:[%s3918_s5 + $0x18] sm:$0xff] }
 0x139   : > { %1609 = vmatpush.bf16.msra.mxu2 %v2514_v31  ;;  %2523 = vmatpush.bf16.msra.mxu3 %v2514_v31 }
 0x13a   : > { %v2600_v36 = vpop.eup %2599  ;;  %v784_v37 = vmul.f32 0.044715, %v692_v33  ;;  %v911_v42 = vmul.f32 0.7978846, %v879_v34  ;;  %v752_v62 = vmul.f32 0.5, %v692_v33 }
 0x13b   : > { %v974_v40 = vadd.f32 1.0, %v2600_v36  ;;  %v2513_v36 = vld [vmem:[%s3918_s5 + $0x10] sm:$0xff] }
 0x13c   : > { %v816_v41 = vmul.f32 %v784_v37, %v692_v33  ;;  %2601 = vtanh.f32 %v911_v42 }
 0x13d   : > { %v1006_v44 = vmul.f32 %v974_v40, %v750_v39  ;;  %1610 = vmatpush.bf16.msra.mxu2 %v2513_v36  ;;  %2524 = vmatpush.bf16.msra.mxu3 %v2513_v36 }
 0x13e   : > { %v848_v45 = vmul.f32 %v816_v41, %v692_v33  ;;  %v2512_v41 = vld [vmem:[%s3918_s5 + $0x8] sm:$0xff] }
 0x13f   : > { %v694_v46 = vpop.f32.mrf.mxu0  ;;  %v1032_v47 = vpack.c.bf16 %v1006_v44, %v1005_v43 }
 0x140   : > { %v695_v48 = vadd.f32 %v3162_v63, %v694_v46  ;;  %v880_v49 = vadd.f32 %v848_v45, %v692_v33 }
 0x141   : > { %2453 = vmatmul.msk.bf16.gmra.mxu1 %vm1079_vm1, %v1032_v47  ;;  %1611 = vmatpush.bf16.msra.mxu2 %v2512_v41  ;;  %v3229_v47 = vld [vmem:[%s3917_s4] ss:$0 sm:$0xff] }
 0x142   : > { %v785_v50 = vmul.f32 0.044715, %v695_v48  ;;  %v912_v51 = vmul.f32 0.7978846, %v880_v49  ;;  %v2602_v53 = vpop.eup %2601  ;;  %v753_v21 = vmul.f32 0.5, %v695_v48  ;;  %2525 = vmatpush.bf16.msra.mxu3 %v2512_v41 }
 0x143   : > { %v975_v58 = vadd.f32 1.0, %v2602_v53 }
 0x144   : > { %v817_v52 = vmul.f32 %v785_v50, %v695_v48  ;;  %2603 = vtanh.f32 %v912_v51  ;;  %v2511_v51 = vld [vmem:[%s3918_s5] sm:$0xff] }
 0x145   : > { %v1007_v3 = vmul.f32 %v975_v58, %v751_v61  ;;  %1612 = vmatpush.bf16.msra.mxu2 %v2511_v51 }
 0x146   : > { %v849_v54 = vmul.f32 %v817_v52, %v695_v48  ;;  %2526 = vmatpush.bf16.msra.mxu3 %v2511_v51 }
 0x147   : > { %v696_v55 = vpop.f32.mrf.mxu0 }
 0x148   : > { %v697_v56 = vadd.f32 %v3162_v63, %v696_v55  ;;  %v881_v57 = vadd.f32 %v849_v54, %v695_v48 }
 0x14a   : > { %v2604_v59 = vpop.eup %2603  ;;  %v786_v60 = vmul.f32 0.044715, %v697_v56  ;;  %v913_v2 = vmul.f32 0.7978846, %v881_v57  ;;  %v754_v22 = vmul.f32 0.5, %v697_v56 }
 0x14b   : > { %v976_v0 = vadd.f32 1.0, %v2604_v59 }
 0x14c   : > { %v818_v1 = vmul.f32 %v786_v60, %v697_v56  ;;  %2605 = vtanh.f32 %v913_v2 }
 0x14d   : > { %v1008_v4 = vmul.f32 %v976_v0, %v752_v62 }
 0x14e   : > { %v850_v5 = vmul.f32 %v818_v1, %v697_v56 }
 0x14f   : > { %v699_v6 = vpop.f32.mrf.mxu0  ;;  %v1033_v7 = vpack.c.bf16 %v1008_v4, %v1007_v3 }
 0x150   : > { %v700_v8 = vadd.f32 %v3162_v63, %v699_v6  ;;  %v882_v9 = vadd.f32 %v850_v5, %v697_v56 }
 0x151   : > { %2454 = vmatmul.msk.bf16.gmra.mxu1 %vm1079_vm1, %v1033_v7 }
 0x152   : > { %v787_v10 = vmul.f32 0.044715, %v700_v8  ;;  %v914_v11 = vmul.f32 0.7978846, %v882_v9  ;;  %v2606_v13 = vpop.eup %2605  ;;  %v755_v48 = vmul.f32 0.5, %v700_v8 }
 0x153   : > { %v977_v18 = vadd.f32 1.0, %v2606_v13 }
 0x154   : > { %v819_v12 = vmul.f32 %v787_v10, %v700_v8  ;;  %2607 = vtanh.f32 %v914_v11 }
 0x155   : > { %v1009_v26 = vmul.f32 %v977_v18, %v753_v21 }
 0x156   : > { %v851_v14 = vmul.f32 %v819_v12, %v700_v8 }
 0x157   : > { %v701_v15 = vpop.f32.mrf.mxu0 }
 0x158   : > { %v702_v16 = vadd.f32 %v3162_v63, %v701_v15  ;;  %v883_v17 = vadd.f32 %v851_v14, %v700_v8 }
 0x15a   : > { %v2608_v19 = vpop.eup %2607  ;;  %v788_v20 = vmul.f32 0.044715, %v702_v16  ;;  %v915_v25 = vmul.f32 0.7978846, %v883_v17  ;;  %v756_v49 = vmul.f32 0.5, %v702_v16 }
 0x15b   : > { %v978_v23 = vadd.f32 1.0, %v2608_v19 }
 0x15c   : > { %v820_v24 = vmul.f32 %v788_v20, %v702_v16  ;;  %2609 = vtanh.f32 %v915_v25 }
 0x15d   : > { %v1010_v27 = vmul.f32 %v978_v23, %v754_v22 }
 0x15e   : > { %v852_v28 = vmul.f32 %v820_v24, %v702_v16 }
 0x15f   : > { %v704_v29 = vpop.f32.mrf.mxu0  ;;  %v1034_v30 = vpack.c.bf16 %v1010_v27, %v1009_v26 }
 0x160   : > { %v705_v32 = vadd.f32 %v3162_v63, %v704_v29  ;;  %v884_v33 = vadd.f32 %v852_v28, %v702_v16 }
 0x161   : > { %2455 = vmatmul.msk.bf16.gmra.mxu1 %vm1079_vm1, %v1034_v30 }
 0x162   : > { %v789_v34 = vmul.f32 0.044715, %v705_v32  ;;  %v916_v35 = vmul.f32 0.7978846, %v884_v33  ;;  %v2610_v38 = vpop.eup %2609  ;;  %v757_v18 = vmul.f32 0.5, %v705_v32 }
 0x163   : > { %v979_v44 = vadd.f32 1.0, %v2610_v38 }
 0x164   : > { %v821_v37 = vmul.f32 %v789_v34, %v705_v32  ;;  %2611 = vtanh.f32 %v916_v35 }
 0x165   : > { %v1011_v54 = vmul.f32 %v979_v44, %v755_v48 }
 0x166   : > { %v853_v39 = vmul.f32 %v821_v37, %v705_v32 }
 0x167   : > { %v706_v40 = vpop.f32.mrf.mxu0 }
 0x168   : > { %v707_v42 = vadd.f32 %v3162_v63, %v706_v40  ;;  %v885_v43 = vadd.f32 %v853_v39, %v705_v32 }
 0x16a   : > { %v2612_v45 = vpop.eup %2611  ;;  %v790_v46 = vmul.f32 0.044715, %v707_v42  ;;  %v917_v53 = vmul.f32 0.7978846, %v885_v43  ;;  %v758_v20 = vmul.f32 0.5, %v707_v42 }
 0x16b   : > { %v980_v50 = vadd.f32 1.0, %v2612_v45 }
 0x16c   : > { %v822_v52 = vmul.f32 %v790_v46, %v707_v42  ;;  %2613 = vtanh.f32 %v917_v53 }
 0x16d   : > { %v1012_v55 = vmul.f32 %v980_v50, %v756_v49 }
 0x16e   : > { %v1137_v56 = vpop.f32.mrf.mxu1  ;;  %v854_v57 = vmul.f32 %v822_v52, %v707_v42 }
 0x16f   : > { %v3235_v58 = vadd.f32 %v3229_v47, %v1137_v56  ;;  %v709_v59 = vpop.f32.mrf.mxu0  ;;  %v1035_v60 = vpack.c.bf16 %v1012_v55, %v1011_v54 }
 0x170   : > { %v3238_v61 = vadd.f32 %v3162_v63, %v709_v59  ;;  %v886_v62 = vadd.f32 %v854_v57, %v707_v42 }
 0x171   : > { %v1249_v0 = vmul.f32 0.044715, %v3235_v58  ;;  %2456 = vmatmul.msk.bf16.gmra.mxu1 %vm1079_vm1, %v1035_v60  ;;  %v1217_v56 = vmul.f32 0.5, %v3235_v58 }
 0x172   : > { %v791_v1 = vmul.f32 0.044715, %v3238_v61  ;;  %v918_v2 = vmul.f32 0.7978846, %v886_v62  ;;  %v2614_v6 = vpop.eup %2613 }
 0x173   : > { %v1281_v3 = vmul.f32 %v1249_v0, %v3235_v58  ;;  %v981_v15 = vadd.f32 1.0, %v2614_v6 }
 0x174   : > { %v823_v4 = vmul.f32 %v791_v1, %v3238_v61  ;;  %2615 = vtanh.f32 %v918_v2  ;;  %v759_v1 = vmul.f32 0.5, %v3238_v61 }
 0x175   : > { %v1313_v5 = vmul.f32 %v1281_v3, %v3235_v58  ;;  %v1013_v25 = vmul.f32 %v981_v15, %v757_v18 }
 0x176   : > { %v1139_v7 = vpop.f32.mrf.mxu1  ;;  %v855_v8 = vmul.f32 %v823_v4, %v3238_v61 }
 0x177   : > { %v1140_v9 = vadd.f32 %v3229_v47, %v1139_v7  ;;  %v711_v10 = vpop.f32.mrf.mxu0  ;;  %v1345_v11 = vadd.f32 %v1313_v5, %v3235_v58 }
 0x178   : > { %v712_v12 = vadd.f32 %v3162_v63, %v711_v10  ;;  %v887_v13 = vadd.f32 %v855_v8, %v3238_v61 }
 0x179   : > { %v1250_v14 = vmul.f32 0.044715, %v1140_v9  ;;  %v1377_v22 = vmul.f32 0.7978846, %v1345_v11  ;;  %v1218_v62 = vmul.f32 0.5, %v1140_v9 }
 0x17a   : > { %v2616_v16 = vpop.eup %2615  ;;  %v792_v17 = vmul.f32 0.044715, %v712_v12  ;;  %v919_v24 = vmul.f32 0.7978846, %v887_v13  ;;  %v760_v3 = vmul.f32 0.5, %v712_v12 }
 0x17b   : > { %v1282_v19 = vmul.f32 %v1250_v14, %v1140_v9  ;;  %v982_v21 = vadd.f32 1.0, %v2616_v16  ;;  %2617 = vtanh.f32 %v1377_v22 }
 0x17c   : > { %v824_v23 = vmul.f32 %v792_v17, %v712_v12  ;;  %2619 = vtanh.f32 %v919_v24 }
 0x17d   : > { %v1014_v26 = vmul.f32 %v982_v21, %v758_v20  ;;  %v1314_v27 = vmul.f32 %v1282_v19, %v1140_v9 }
 0x17e   : > { %v1142_v28 = vpop.f32.mrf.mxu1  ;;  %v856_v29 = vmul.f32 %v824_v23, %v712_v12 }
 0x17f   : > { %v3252_v30 = vadd.f32 %v3229_v47, %v1142_v28  ;;  %v714_v31 = vpop.f32.mrf.mxu0  ;;  %v1036_v33 = vpack.c.bf16 %v1014_v26, %v1013_v25  ;;  %v1346_v34 = vadd.f32 %v1314_v27, %v1140_v9 }
 0x180   : > { %v3255_v32 = vadd.f32 %v3162_v63, %v714_v31  ;;  %v888_v35 = vadd.f32 %v856_v29, %v712_v12 }
 0x181   : > { %v1251_v36 = vmul.f32 0.044715, %v3252_v30  ;;  %2457 = vmatmul.msk.bf16.gmra.mxu1 %vm1079_vm1, %v1036_v33  ;;  %v1378_v37 = vmul.f32 0.7978846, %v1346_v34  ;;  %v2618_v42 = vpop.eup %2617 }
 0x182   : > { %v793_v38 = vmul.f32 0.044715, %v3255_v32  ;;  %v920_v39 = vmul.f32 0.7978846, %v888_v35  ;;  %v2620_v44 = vpop.eup %2619  ;;  %v1441_v52 = vadd.f32 1.0, %v2618_v42 }
 0x183   : > { %v1283_v40 = vmul.f32 %v1251_v36, %v3252_v30  ;;  %2621 = vtanh.f32 %v1378_v37  ;;  %v983_v57 = vadd.f32 1.0, %v2620_v44 }
 0x184   : > { %v825_v41 = vmul.f32 %v793_v38, %v3255_v32  ;;  %2623 = vtanh.f32 %v920_v39  ;;  %v1473_v7 = vmul.f32 %v1441_v52, %v1217_v56 }
 0x185   : > { %v1315_v43 = vmul.f32 %v1283_v40, %v3252_v30  ;;  %v1015_v11 = vmul.f32 %v983_v57, %v759_v1 }
 0x186   : > { %v1144_v45 = vpop.f32.mrf.mxu1  ;;  %v857_v46 = vmul.f32 %v825_v41, %v3255_v32  ;;  %v1219_v41 = vmul.f32 0.5, %v3252_v30 }
 0x187   : > { %v3265_v48 = vadd.f32 %v3229_v47, %v1144_v45  ;;  %v716_v49 = vpop.f32.mrf.mxu0  ;;  %v1347_v50 = vadd.f32 %v1315_v43, %v3252_v30 }
 0x188   : > { %v3269_v51 = vadd.f32 %v3162_v63, %v716_v49  ;;  %v889_v53 = vadd.f32 %v857_v46, %v3255_v32  ;;  %v761_v49 = vmul.f32 0.5, %v3255_v32 }
 0x189   : > { %v2622_v54 = vpop.eup %2621  ;;  %v1252_v55 = vmul.f32 0.044715, %v3265_v48  ;;  %v1379_v5 = vmul.f32 0.7978846, %v1347_v50  ;;  %v1220_v45 = vmul.f32 0.5, %v3265_v48 }
 0x18a   : > { %v2624_v59 = vpop.eup %2623  ;;  %v794_v60 = vmul.f32 0.044715, %v3269_v51  ;;  %v1442_v0 = vadd.f32 1.0, %v2622_v54  ;;  %v921_v10 = vmul.f32 0.7978846, %v889_v53  ;;  %v762_v52 = vmul.f32 0.5, %v3269_v51 }
 0x18b   : > { %v1284_v2 = vmul.f32 %v1252_v55, %v3265_v48  ;;  %v984_v4 = vadd.f32 1.0, %v2624_v59  ;;  %2625 = vtanh.f32 %v1379_v5 }
 0x18c   : > { %v826_v6 = vmul.f32 %v794_v60, %v3269_v51  ;;  %v1474_v8 = vmul.f32 %v1442_v0, %v1218_v62  ;;  %2627 = vtanh.f32 %v921_v10 }
 0x18d   : > { %v1016_v58 = vmul.f32 %v984_v4, %v760_v3  ;;  %v1316_v13 = vmul.f32 %v1284_v2, %v3265_v48 }
 0x18e   : > { %v1147_v14 = vpop.f32.mrf.mxu1  ;;  %v1505_v15 = vpack.c.bf16 %v1474_v8, %v1473_v7  ;;  %v858_v9 = vmul.f32 %v826_v6, %v3269_v51 }
 0x18f   : > { %v3281_v61 = vadd.f32 %v3229_v47, %v1147_v14  ;;  %v719_v16 = vpop.f32.mrf.mxu0  ;;  %v1037_v12 = vpack.c.bf16 %v1016_v58, %v1015_v11  ;;  %v1348_v17 = vadd.f32 %v1316_v13, %v3265_v48 }
 0x190   : > { %v3285_v18 = vadd.f32 %v3162_v63, %v719_v16  ;;  %2480 = vmatmul.msk.bf16.vlgmr.msra.gmra.mxu2 %vm1079_vm1, %v1505_v15  ;;  %v890_v19 = vadd.f32 %v858_v9, %v3269_v51 }
 0x191   : > { %v1253_v20 = vmul.f32 0.044715, %v3281_v61  ;;  %2458 = vmatmul.msk.bf16.gmra.mxu1 %vm1079_vm1, %v1037_v12  ;;  %v1380_v21 = vmul.f32 0.7978846, %v1348_v17  ;;  %v2626_v26 = vpop.eup %2625 }
 0x192   : > { %v795_v22 = vmul.f32 0.044715, %v3285_v18  ;;  %v922_v23 = vmul.f32 0.7978846, %v890_v19  ;;  %v2628_v28 = vpop.eup %2627  ;;  %v1443_v38 = vadd.f32 1.0, %v2626_v26  ;;  %v1221_v26 = vmul.f32 0.5, %v3281_v61 }
 0x193   : > { %v1285_v24 = vmul.f32 %v1253_v20, %v3281_v61  ;;  %2629 = vtanh.f32 %v1380_v21  ;;  %v985_v42 = vadd.f32 1.0, %v2628_v28  ;;  %v734_v21 = vpop.f32.mrf.mxu3 }
 0x194   : > { %v827_v25 = vmul.f32 %v795_v22, %v3285_v18  ;;  %2631 = vtanh.f32 %v922_v23  ;;  %v1475_v57 = vmul.f32 %v1443_v38, %v1219_v41 }
 0x195   : > { %v1317_v27 = vmul.f32 %v1285_v24, %v3281_v61  ;;  %v1017_v59 = vmul.f32 %v985_v42, %v761_v49 }
 0x196   : > { %v859_v29 = vmul.f32 %v827_v25, %v3285_v18  ;;  %v1149_v31 = vpop.f32.mrf.mxu1 }
 0x197   : > { %v3297_v33 = vadd.f32 %v3229_v47, %v1149_v31  ;;  %v721_v34 = vpop.f32.mrf.mxu0  ;;  %v1349_v35 = vadd.f32 %v1317_v27, %v3281_v61 }
 0x198   : > { %v891_v36 = vadd.f32 %v859_v29, %v3285_v18  ;;  %v3302_v37 = vadd.f32 %v3162_v63, %v721_v34 }
 0x199   : > { %v2630_v39 = vpop.eup %2629  ;;  %v1254_v40 = vmul.f32 0.044715, %v3297_v33  ;;  %v1381_v54 = vmul.f32 0.7978846, %v1349_v35  ;;  %v1222_v31 = vmul.f32 0.5, %v3297_v33  ;;  %v763_v35 = vmul.f32 0.5, %v3285_v18 }
 0x19a   : > { %v2632_v43 = vpop.eup %2631  ;;  %v796_v44 = vmul.f32 0.044715, %v3302_v37  ;;  %v1444_v46 = vadd.f32 1.0, %v2630_v39  ;;  %v923_v55 = vmul.f32 0.7978846, %v891_v36  ;;  %v764_v38 = vmul.f32 0.5, %v3302_v37 }
 0x19b   : > { %v1286_v50 = vmul.f32 %v1254_v40, %v3297_v33  ;;  %v986_v53 = vadd.f32 1.0, %v2632_v43  ;;  %2633 = vtanh.f32 %v1381_v54  ;;  %v3353_v54 = vadd.f32 %v3162_v63, %v734_v21 }
 0x19c   : > { %v828_v56 = vmul.f32 %v796_v44, %v3302_v37  ;;  %v1476_v30 = vmul.f32 %v1444_v46, %v1220_v45  ;;  %2635 = vtanh.f32 %v923_v55 }
 0x19d   : > { %v1018_v60 = vmul.f32 %v986_v53, %v762_v52  ;;  %v1318_v62 = vmul.f32 %v1286_v50, %v3297_v33 }
 0x19e   : > { %v860_v48 = vmul.f32 %v828_v56, %v3302_v37  ;;  %v1152_v0 = vpop.f32.mrf.mxu1  ;;  %v1506_v1 = vpack.c.bf16 %v1476_v30, %v1475_v57 }
 0x19f   : > { %v3315_v32 = vadd.f32 %v3229_v47, %v1152_v0  ;;  %v724_v2 = vpop.f32.mrf.mxu0  ;;  %v1038_v51 = vpack.c.bf16 %v1018_v60, %v1017_v59  ;;  %v1350_v3 = vadd.f32 %v1318_v62, %v3297_v33  ;;  %v736_v60 = vpop.f32.mrf.mxu3  ;;  %v801_v0 = vmul.f32 0.044715, %v3353_v54 }
 0x1a0   : > { %v892_v4 = vadd.f32 %v860_v48, %v3302_v37  ;;  %v3320_v5 = vadd.f32 %v3162_v63, %v724_v2  ;;  %2481 = vmatmul.msk.bf16.gmra.mxu2 %vm1079_vm1, %v1506_v1 }
 0x1a1   : > { %v1255_v6 = vmul.f32 0.044715, %v3315_v32  ;;  %2459 = vmatmul.msk.bf16.gmra.mxu1 %vm1079_vm1, %v1038_v51  ;;  %v1382_v7 = vmul.f32 0.7978846, %v1350_v3  ;;  %v2634_v13 = vpop.eup %2633  ;;  %v3367_v51 = vadd.f32 %v3162_v63, %v736_v60 }
 0x1a2   : > { %v924_v8 = vmul.f32 0.7978846, %v892_v4  ;;  %v797_v10 = vmul.f32 0.044715, %v3320_v5  ;;  %v2636_v15 = vpop.eup %2635  ;;  %v1445_v23 = vadd.f32 1.0, %v2634_v13 }
 0x1a3   : > { %v1287_v11 = vmul.f32 %v1255_v6, %v3315_v32  ;;  %2637 = vtanh.f32 %v1382_v7  ;;  %v987_v27 = vadd.f32 1.0, %v2636_v15 }
 0x1a4   : > { %v829_v58 = vmul.f32 %v797_v10, %v3320_v5  ;;  %2639 = vtanh.f32 %v924_v8  ;;  %v1477_v43 = vmul.f32 %v1445_v23, %v1221_v26  ;;  %v765_v26 = vmul.f32 0.5, %v3320_v5 }
 0x1a5   : > { %v1319_v14 = vmul.f32 %v1287_v11, %v3315_v32  ;;  %v1019_v44 = vmul.f32 %v987_v27, %v763_v35 }
 0x1a6   : > { %v861_v9 = vmul.f32 %v829_v58, %v3320_v5  ;;  %v1154_v16 = vpop.f32.mrf.mxu1  ;;  %v833_v58 = vmul.f32 %v801_v0, %v3353_v54 }
 0x1a7   : > { %v3331_v12 = vadd.f32 %v3229_v47, %v1154_v16  ;;  %v726_v17 = vpop.f32.mrf.mxu0  ;;  %v1351_v19 = vadd.f32 %v1319_v14, %v3315_v32  ;;  %v802_v16 = vmul.f32 0.044715, %v3367_v51 }
 0x1a8   : > { %v893_v20 = vadd.f32 %v861_v9, %v3320_v5  ;;  %v3336_v22 = vadd.f32 %v3162_v63, %v726_v17 }
 0x1a9   : > { %v2638_v24 = vpop.eup %2637  ;;  %v1256_v25 = vmul.f32 0.044715, %v3331_v12  ;;  %v1383_v40 = vmul.f32 0.7978846, %v1351_v19  ;;  %v1223_v19 = vmul.f32 0.5, %v3315_v32 }
 0x1aa   : > { %v2640_v28 = vpop.eup %2639  ;;  %v798_v29 = vmul.f32 0.044715, %v3336_v22  ;;  %v1446_v34 = vadd.f32 1.0, %v2638_v24  ;;  %v925_v41 = vmul.f32 0.7978846, %v893_v20  ;;  %v1224_v24 = vmul.f32 0.5, %v3331_v12 }
 0x1ab   : > { %v1288_v36 = vmul.f32 %v1256_v25, %v3331_v12  ;;  %v988_v39 = vadd.f32 1.0, %v2640_v28  ;;  %2641 = vtanh.f32 %v1383_v40  ;;  %v766_v28 = vmul.f32 0.5, %v3336_v22 }
 0x1ac   : > { %v830_v42 = vmul.f32 %v798_v29, %v3336_v22  ;;  %v1478_v61 = vmul.f32 %v1446_v34, %v1222_v31  ;;  %2643 = vtanh.f32 %v925_v41 }
 0x1ad   : > { %v1020_v45 = vmul.f32 %v988_v39, %v764_v38  ;;  %v1320_v46 = vmul.f32 %v1288_v36, %v3331_v12  ;;  %v834_v38 = vmul.f32 %v802_v16, %v3367_v51 }
 0x1ae   : > { %v862_v33 = vmul.f32 %v830_v42, %v3336_v22  ;;  %v1157_v49 = vpop.f32.mrf.mxu1  ;;  %v1507_v50 = vpack.c.bf16 %v1478_v61, %v1477_v43 }
 0x1af   : > { %v3349_v18 = vadd.f32 %v3229_v47, %v1157_v49  ;;  %v729_v52 = vpop.f32.mrf.mxu0  ;;  %v1039_v37 = vpack.c.bf16 %v1020_v45, %v1019_v44  ;;  %v1352_v53 = vadd.f32 %v1320_v46, %v3331_v12  ;;  %v865_v45 = vmul.f32 %v833_v58, %v3353_v54 }
 0x1b0   : > { %v894_v55 = vadd.f32 %v862_v33, %v3336_v22  ;;  %v3357_v56 = vadd.f32 %v3162_v63, %v729_v52  ;;  %2482 = vmatmul.msk.bf16.gmra.mxu2 %vm1079_vm1, %v1507_v50  ;;  %v2833_v63 = vld [vmem:[%s3931_s2] ss:$0 sm:$0xff]  ;;  %v866_v49 = vmul.f32 %v834_v38, %v3367_v51 }
 0x1b1   : > { %v1257_v57 = vmul.f32 0.044715, %v3349_v18  ;;  %2460 = vmatmul.msk.bf16.gmra.mxu1 %vm1079_vm1, %v1039_v37  ;;  %v1384_v30 = vmul.f32 0.7978846, %v1352_v53  ;;  %v2642_v2 = vpop.eup %2641  ;;  %v897_v37 = vadd.f32 %v865_v45, %v3353_v54 }
 0x1b2   : > { %v926_v59 = vmul.f32 0.7978846, %v894_v55  ;;  %v799_v62 = vmul.f32 0.044715, %v3357_v56  ;;  %v2644_v4 = vpop.eup %2643  ;;  %v1447_v15 = vadd.f32 1.0, %v2642_v2  ;;  %v767_v58 = vmul.f32 0.5, %v3357_v56 }
 0x1b3   : > { %v1289_v48 = vmul.f32 %v1257_v57, %v3349_v18  ;;  %2645 = vtanh.f32 %v1384_v30  ;;  %v989_v20 = vadd.f32 1.0, %v2644_v4  ;;  %v898_v57 = vadd.f32 %v866_v49, %v3367_v51 }
 0x1b4   : > { %v831_v1 = vmul.f32 %v799_v62, %v3357_v56  ;;  %2647 = vtanh.f32 %v926_v59  ;;  %v1479_v36 = vmul.f32 %v1447_v15, %v1223_v19  ;;  %v929_v0 = vmul.f32 0.7978846, %v897_v37 }
 0x1b5   : > { %v1321_v3 = vmul.f32 %v1289_v48, %v3349_v18  ;;  %v1021_v39 = vmul.f32 %v989_v20, %v765_v26  ;;  %v930_v4 = vmul.f32 0.7978846, %v898_v57 }
 0x1b6   : > { %v863_v6 = vmul.f32 %v831_v1, %v3357_v56  ;;  %v1159_v7 = vpop.f32.mrf.mxu1 }
 0x1b7   : > { %v3372_v8 = vadd.f32 %v3229_v47, %v1159_v7  ;;  %v731_v10 = vpop.f32.mrf.mxu0  ;;  %v1353_v11 = vadd.f32 %v1321_v3, %v3349_v18  ;;  %v1225_v7 = vmul.f32 0.5, %v3349_v18 }
 0x1b8   : > { %v895_v13 = vadd.f32 %v863_v6, %v3357_v56  ;;  %v3380_v14 = vadd.f32 %v2833_v63, %v731_v10 }
 0x1b9   : > { %v2646_v9 = vpop.eup %2645  ;;  %v1258_v17 = vmul.f32 0.044715, %v3372_v8  ;;  %v1385_v31 = vmul.f32 0.7978846, %v1353_v11  ;;  %v1226_v10 = vmul.f32 0.5, %v3372_v8 }
 0x1ba   : > { %v2648_v21 = vpop.eup %2647  ;;  %v800_v23 = vmul.f32 0.044715, %v3380_v14  ;;  %v1448_v25 = vadd.f32 1.0, %v2646_v9  ;;  %v927_v34 = vmul.f32 0.7978846, %v895_v13  ;;  %v768_v63 = vmul.f32 0.5, %v3380_v14 }
 0x1bb   : > { %v1290_v27 = vmul.f32 %v1258_v17, %v3372_v8  ;;  %v990_v29 = vadd.f32 1.0, %v2648_v21  ;;  %2649 = vtanh.f32 %v1385_v31 }
 0x1bc   : > { %v832_v35 = vmul.f32 %v800_v23, %v3380_v14  ;;  %v1480_v32 = vmul.f32 %v1448_v25, %v1224_v24  ;;  %2651 = vtanh.f32 %v927_v34 }
 0x1bd   : > { %v1022_v40 = vmul.f32 %v990_v29, %v766_v28  ;;  %v1322_v12 = vmul.f32 %v1290_v27, %v3372_v8 }
 0x1be   : > { %v864_v41 = vmul.f32 %v832_v35, %v3380_v14  ;;  %v1162_v5 = vpop.f32.mrf.mxu1  ;;  %v1508_v42 = vpack.c.bf16 %v1480_v32, %v1479_v36  ;;  %v769_v35 = vmul.f32 0.5, %v3353_v54  ;;  %v770_v36 = vmul.f32 0.5, %v3367_v51 }
 0x1bf   : > { %v3395_v43 = vadd.f32 %v3229_v47, %v1162_v5  ;;  %v1040_v22 = vpack.c.bf16 %v1022_v40, %v1021_v39  ;;  %v1354_v61 = vadd.f32 %v1322_v12, %v3372_v8 }
 0x1c0   : > { %v896_v44 = vadd.f32 %v864_v41, %v3380_v14  ;;  %2483 = vmatmul.msk.bf16.gmra.mxu2 %vm1079_vm1, %v1508_v42 }
 0x1c1   : > { %v1259_v46 = vmul.f32 0.044715, %v3395_v43  ;;  %2461 = vmatmul.msk.bf16.gmra.mxu1 %vm1079_vm1, %v1040_v22  ;;  %v1386_v33 = vmul.f32 0.7978846, %v1354_v61  ;;  %v2650_v53 = vpop.eup %2649  ;;  %v1227_v42 = vmul.f32 0.5, %v3395_v43 }
 0x1c2   : > { %v928_v50 = vmul.f32 0.7978846, %v896_v44  ;;  %v2652_v30 = vpop.eup %2651  ;;  %v1449_v48 = vadd.f32 1.0, %v2650_v53 }
 0x1c3   : > { %v1291_v52 = vmul.f32 %v1259_v46, %v3395_v43  ;;  %2653 = vtanh.f32 %v1386_v33  ;;  %v991_v3 = vadd.f32 1.0, %v2652_v30 }
 0x1c4   : > { %2655 = vtanh.f32 %v928_v50  ;;  %v1481_v16 = vmul.f32 %v1449_v48, %v1225_v7 }
 0x1c5   : > { %v1323_v55 = vmul.f32 %v1291_v52, %v3395_v43  ;;  %v1023_v19 = vmul.f32 %v991_v3, %v767_v58  ;;  %2657 = vtanh.f32 %v929_v0 }
 0x1c6   : > { %v1164_v59 = vpop.f32.mrf.mxu1  ;;  %2659 = vtanh.f32 %v930_v4 }
 0x1c7   : > { %v1165_v60 = vadd.f32 %v3229_v47, %v1164_v59  ;;  %v1355_v62 = vadd.f32 %v1323_v55, %v3395_v43 }
 0x1c9   : > { %v2654_v1 = vpop.eup %2653  ;;  %v1260_v2 = vmul.f32 0.044715, %v1165_v60  ;;  %v1387_v9 = vmul.f32 0.7978846, %v1355_v62  ;;  %v1228_v22 = vmul.f32 0.5, %v1165_v60 }
 0x1ca   : > { %v2656_v6 = vpop.eup %2655  ;;  %v1450_v11 = vadd.f32 1.0, %v2654_v1 }
 0x1cb   : > { %v1292_v13 = vmul.f32 %v1260_v2, %v1165_v60  ;;  %v992_v15 = vadd.f32 1.0, %v2656_v6  ;;  %2661 = vtanh.f32 %v1387_v9  ;;  %v2658_v26 = vpop.eup %2657 }
 0x1cc   : > { %v1482_v17 = vmul.f32 %v1450_v11, %v1226_v10  ;;  %v2660_v28 = vpop.eup %2659  ;;  %v993_v38 = vadd.f32 1.0, %v2658_v26 }
 0x1cd   : > { %v1024_v20 = vmul.f32 %v992_v15, %v768_v63  ;;  %v1324_v21 = vmul.f32 %v1292_v13, %v1165_v60  ;;  %v994_v39 = vadd.f32 1.0, %v2660_v28 }
 0x1ce   : > { %v1167_v23 = vpop.f32.mrf.mxu1  ;;  %v1509_v24 = vpack.c.bf16 %v1482_v17, %v1481_v16  ;;  %v1025_v45 = vmul.f32 %v993_v38, %v769_v35 }
 0x1cf   : > { %v1168_v18 = vadd.f32 %v3229_v47, %v1167_v23  ;;  %v1041_v8 = vpack.c.bf16 %v1024_v20, %v1023_v19  ;;  %v1356_v25 = vadd.f32 %v1324_v21, %v1165_v60  ;;  %v1026_v46 = vmul.f32 %v994_v39, %v770_v36 }
 0x1d0   : > { %2484 = vmatmul.msk.bf16.gmra.mxu2 %vm1079_vm1, %v1509_v24 }
 0x1d1   : > { %v1261_v56 = vmul.f32 0.044715, %v1168_v18  ;;  %2462 = vmatmul.msk.bf16.vlgmr.msrb.gmra.mxu3 %vm1079_vm1, %v1041_v8  ;;  %v1388_v14 = vmul.f32 0.7978846, %v1356_v25  ;;  %v2662_v29 = vpop.eup %2661  ;;  %v1042_v53 = vpack.c.bf16 %v1026_v46, %v1025_v45  ;;  %v1229_v4 = vmul.f32 0.5, %v1168_v18 }
 0x1d2   : > { %v1451_v12 = vadd.f32 1.0, %v2662_v29 }
 0x1d3   : > { %v1293_v27 = vmul.f32 %v1261_v56, %v1168_v18  ;;  %2663 = vtanh.f32 %v1388_v14 }
 0x1d4   : > { %v1483_v49 = vmul.f32 %v1451_v12, %v1227_v42 }
 0x1d5   : > { %v1325_v31 = vmul.f32 %v1293_v27, %v1168_v18 }
 0x1d6   : > { %v1169_v34 = vpop.f32.mrf.mxu1 }
 0x1d7   : > { %v1170_v32 = vadd.f32 %v3229_v47, %v1169_v34  ;;  %v1357_v40 = vadd.f32 %v1325_v31, %v1168_v18 }
 0x1d9   : > { %v2664_v41 = vpop.eup %2663  ;;  %v1262_v5 = vmul.f32 0.044715, %v1170_v32  ;;  %v1389_v33 = vmul.f32 0.7978846, %v1357_v40  ;;  %v1230_v6 = vmul.f32 0.5, %v1170_v32 }
 0x1da   : > { %v1452_v61 = vadd.f32 1.0, %v2664_v41 }
 0x1db   : > { %v1294_v44 = vmul.f32 %v1262_v5, %v1170_v32  ;;  %2665 = vtanh.f32 %v1389_v33 }
 0x1dc   : > { %v1484_v54 = vmul.f32 %v1452_v61, %v1228_v22 }
 0x1dd   : > { %v1326_v50 = vmul.f32 %v1294_v44, %v1170_v32 }
 0x1de   : > { %v1172_v51 = vpop.f32.mrf.mxu1  ;;  %v1510_v52 = vpack.c.bf16 %v1484_v54, %v1483_v49 }
 0x1df   : > { %v1173_v37 = vadd.f32 %v3229_v47, %v1172_v51  ;;  %v1358_v55 = vadd.f32 %v1326_v50, %v1170_v32 }
 0x1e0   : > { %2485 = vmatmul.msk.bf16.gmra.mxu2 %vm1079_vm1, %v1510_v52 }
 0x1e1   : > { %v1263_v57 = vmul.f32 0.044715, %v1173_v37  ;;  %2463 = vmatmul.msk.bf16.gmra.mxu3 %vm1079_vm1, %v1042_v53  ;;  %v1390_v43 = vmul.f32 0.7978846, %v1358_v55  ;;  %v2666_v59 = vpop.eup %2665  ;;  %v1231_v27 = vmul.f32 0.5, %v1173_v37 }
 0x1e2   : > { %v1453_v1 = vadd.f32 1.0, %v2666_v59 }
 0x1e3   : > { %v1295_v30 = vmul.f32 %v1263_v57, %v1173_v37  ;;  %2667 = vtanh.f32 %v1390_v43 }
 0x1e4   : > { %v1485_v58 = vmul.f32 %v1453_v1, %v1229_v4 }
 0x1e5   : > { %v1327_v60 = vmul.f32 %v1295_v30, %v1173_v37 }
 0x1e6   : > { %v1174_v62 = vpop.f32.mrf.mxu1 }
 0x1e7   : > { %v1175_v48 = vadd.f32 %v3229_v47, %v1174_v62  ;;  %v1359_v0 = vadd.f32 %v1327_v60, %v1173_v37 }
 0x1e9   : > { %v2668_v2 = vpop.eup %2667  ;;  %v1264_v3 = vmul.f32 0.044715, %v1175_v48  ;;  %v1391_v11 = vmul.f32 0.7978846, %v1359_v0  ;;  %v1232_v28 = vmul.f32 0.5, %v1175_v48 }
 0x1ea   : > { %v1454_v7 = vadd.f32 1.0, %v2668_v2 }
 0x1eb   : > { %v1296_v10 = vmul.f32 %v1264_v3, %v1175_v48  ;;  %2669 = vtanh.f32 %v1391_v11 }
 0x1ec   : > { %v1486_v13 = vmul.f32 %v1454_v7, %v1230_v6 }
 0x1ed   : > { %v1328_v63 = vmul.f32 %v1296_v10, %v1175_v48 }
 0x1ee   : > { %v1177_v15 = vpop.f32.mrf.mxu1  ;;  %v1511_v9 = vpack.c.bf16 %v1486_v13, %v1485_v58 }
 0x1ef   : > { %v1178_v16 = vadd.f32 %v3229_v47, %v1177_v15  ;;  %v1360_v17 = vadd.f32 %v1328_v63, %v1175_v48 }
 0x1f0   : > { %2486 = vmatmul.msk.bf16.gmra.mxu2 %vm1079_vm1, %v1511_v9 }
 0x1f1   : > { %v1265_v19 = vmul.f32 0.044715, %v1178_v16  ;;  %v1392_v20 = vmul.f32 0.7978846, %v1360_v17  ;;  %v2670_v23 = vpop.eup %2669  ;;  %v1233_v50 = vmul.f32 0.5, %v1178_v16 }
 0x1f2   : > { %v1455_v56 = vadd.f32 1.0, %v2670_v23 }
 0x1f3   : > { %v1297_v21 = vmul.f32 %v1265_v19, %v1178_v16  ;;  %2671 = vtanh.f32 %v1392_v20 }
 0x1f4   : > { %v1487_v35 = vmul.f32 %v1455_v56, %v1231_v27 }
 0x1f5   : > { %v1329_v24 = vmul.f32 %v1297_v21, %v1178_v16 }
 0x1f6   : > { %v1179_v18 = vpop.f32.mrf.mxu1 }
 0x1f7   : > { %v1180_v8 = vadd.f32 %v3229_v47, %v1179_v18  ;;  %v1361_v25 = vadd.f32 %v1329_v24, %v1178_v16 }
 0x1f9   : > { %v2672_v14 = vpop.eup %2671  ;;  %v1266_v26 = vmul.f32 0.044715, %v1180_v8  ;;  %v1393_v34 = vmul.f32 0.7978846, %v1361_v25  ;;  %v1234_v51 = vmul.f32 0.5, %v1180_v8 }
 0x1fa   : > { %v1456_v29 = vadd.f32 1.0, %v2672_v14 }
 0x1fb   : > { %v1298_v31 = vmul.f32 %v1266_v26, %v1180_v8  ;;  %2673 = vtanh.f32 %v1393_v34 }
 0x1fc   : > { %v1488_v36 = vmul.f32 %v1456_v29, %v1232_v28 }
 0x1fd   : > { %v1330_v32 = vmul.f32 %v1298_v31, %v1180_v8 }
 0x1fe   : > { %v1182_v38 = vpop.f32.mrf.mxu1  ;;  %v1512_v39 = vpack.c.bf16 %v1488_v36, %v1487_v35 }
 0x1ff   : > { %v1183_v40 = vadd.f32 %v3229_v47, %v1182_v38  ;;  %v1362_v12 = vadd.f32 %v1330_v32, %v1180_v8 }
 0x200   : > { %2487 = vmatmul.msk.bf16.gmra.mxu2 %vm1079_vm1, %v1512_v39 }
 0x201   : > { %v1267_v41 = vmul.f32 0.044715, %v1183_v40  ;;  %v1394_v5 = vmul.f32 0.7978846, %v1362_v12  ;;  %v2674_v22 = vpop.eup %2673  ;;  %v1235_v63 = vmul.f32 0.5, %v1183_v40 }
 0x202   : > { %v1457_v33 = vadd.f32 1.0, %v2674_v22 }
 0x203   : > { %v1299_v42 = vmul.f32 %v1267_v41, %v1183_v40  ;;  %2675 = vtanh.f32 %v1394_v5 }
 0x204   : > { %v1489_v55 = vmul.f32 %v1457_v33, %v1233_v50 }
 0x205   : > { %v1331_v61 = vmul.f32 %v1299_v42, %v1183_v40 }
 0x206   : > { %v1184_v44 = vpop.f32.mrf.mxu1 }
 0x207   : > { %v1185_v45 = vadd.f32 %v3229_v47, %v1184_v44  ;;  %v1363_v46 = vadd.f32 %v1331_v61, %v1183_v40 }
 0x209   : > { %v2676_v49 = vpop.eup %2675  ;;  %v1268_v54 = vmul.f32 0.044715, %v1185_v45  ;;  %v1395_v53 = vmul.f32 0.7978846, %v1363_v46  ;;  %v1236_v15 = vmul.f32 0.5, %v1185_v45 }
 0x20a   : > { %v1458_v52 = vadd.f32 1.0, %v2676_v49 }
 0x20b   : > { %v1300_v37 = vmul.f32 %v1268_v54, %v1185_v45  ;;  %2677 = vtanh.f32 %v1395_v53 }
 0x20c   : > { %v1490_v57 = vmul.f32 %v1458_v52, %v1234_v51 }
 0x20d   : > { %v1332_v43 = vmul.f32 %v1300_v37, %v1185_v45 }
 0x20e   : > { %v1187_v30 = vpop.f32.mrf.mxu1  ;;  %v1513_v59 = vpack.c.bf16 %v1490_v57, %v1489_v55 }
 0x20f   : > { %v1188_v60 = vadd.f32 %v3229_v47, %v1187_v30  ;;  %v1364_v62 = vadd.f32 %v1332_v43, %v1185_v45 }
 0x210   : > { %2488 = vmatmul.msk.bf16.gmra.mxu2 %vm1079_vm1, %v1513_v59 }
 0x211   : > { %v1269_v48 = vmul.f32 0.044715, %v1188_v60  ;;  %v1396_v0 = vmul.f32 0.7978846, %v1364_v62  ;;  %v2678_v3 = vpop.eup %2677  ;;  %v1237_v39 = vmul.f32 0.5, %v1188_v60 }
 0x212   : > { %v1459_v11 = vadd.f32 1.0, %v2678_v3 }
 0x213   : > { %v1301_v1 = vmul.f32 %v1269_v48, %v1188_v60  ;;  %v3433_v2 = vpop.f32.mrf.mxu2  ;;  %2679 = vtanh.f32 %v1396_v0 }
 0x214   : > { %v1491_v20 = vmul.f32 %v1459_v11, %v1235_v63 }
 0x215   : > { %v1333_v4 = vmul.f32 %v1301_v1, %v1188_v60 }
 0x216   : > { %v1189_v6 = vpop.f32.mrf.mxu1 }
 0x217   : > { %v1190_v7 = vadd.f32 %v3229_v47, %v1189_v6  ;;  %v1365_v10 = vadd.f32 %v1333_v4, %v1188_v60 }
 0x219   : > { %v2680_v58 = vpop.eup %2679  ;;  %v1270_v13 = vmul.f32 0.044715, %v1190_v7  ;;  %v1397_v19 = vmul.f32 0.7978846, %v1365_v10  ;;  %v1238_v40 = vmul.f32 0.5, %v1190_v7 }
 0x21a   : > { %v1460_v9 = vadd.f32 1.0, %v2680_v58 }
 0x21b   : > { %v1302_v16 = vmul.f32 %v1270_v13, %v1190_v7  ;;  %v3436_v17 = vpop.f32.mrf.mxu2  ;;  %2681 = vtanh.f32 %v1397_v19 }
 0x21c   : > { %v1492_v21 = vmul.f32 %v1460_v9, %v1236_v15 }
 0x21d   : > { %v1334_v23 = vmul.f32 %v1302_v16, %v1190_v7 }
 0x21e   : > { %v1192_v24 = vpop.f32.mrf.mxu1  ;;  %v1514_v18 = vpack.c.bf16 %v1492_v21, %v1491_v20 }
 0x21f   : > { %v1193_v8 = vadd.f32 %v3229_v47, %v1192_v24  ;;  %v1366_v25 = vadd.f32 %v1334_v23, %v1190_v7 }
 0x220   : > { %2489 = vmatmul.msk.bf16.gmra.mxu2 %vm1079_vm1, %v1514_v18 }
 0x221   : > { %v1271_v56 = vmul.f32 0.044715, %v1193_v8  ;;  %v1398_v14 = vmul.f32 0.7978846, %v1366_v25  ;;  %v2682_v28 = vpop.eup %2681  ;;  %v1239_v62 = vmul.f32 0.5, %v1193_v8 }
 0x222   : > { %v1461_v36 = vadd.f32 1.0, %v2682_v28 }
 0x223   : > { %v1303_v26 = vmul.f32 %v1271_v56, %v1193_v8  ;;  %v3440_v27 = vpop.f32.mrf.mxu2  ;;  %2683 = vtanh.f32 %v1398_v14 }
 0x224   : > { %v1493_v22 = vmul.f32 %v1461_v36, %v1237_v39 }
 0x225   : > { %v1335_v29 = vmul.f32 %v1303_v26, %v1193_v8 }
 0x226   : > { %v1194_v31 = vpop.f32.mrf.mxu1 }
 0x227   : > { %v1195_v34 = vadd.f32 %v3229_v47, %v1194_v31  ;;  %v1367_v35 = vadd.f32 %v1335_v29, %v1193_v8 }
 0x229   : > { %v2684_v32 = vpop.eup %2683  ;;  %v1272_v38 = vmul.f32 0.044715, %v1195_v34  ;;  %v1399_v42 = vmul.f32 0.7978846, %v1367_v35  ;;  %v1240_v48 = vmul.f32 0.5, %v1195_v34 }
 0x22a   : > { %v1462_v12 = vadd.f32 1.0, %v2684_v32 }
 0x22b   : > { %v1304_v41 = vmul.f32 %v1272_v38, %v1195_v34  ;;  %v3443_v5 = vpop.f32.mrf.mxu2  ;;  %2685 = vtanh.f32 %v1399_v42 }
 0x22c   : > { %v1494_v61 = vmul.f32 %v1462_v12, %v1238_v40 }
 0x22d   : > { %v1336_v44 = vmul.f32 %v1304_v41, %v1195_v34 }
 0x22e   : > { %v1197_v45 = vpop.f32.mrf.mxu1  ;;  %v1515_v46 = vpack.c.bf16 %v1494_v61, %v1493_v22 }
 0x22f   : > { %v1198_v33 = vadd.f32 %v3229_v47, %v1197_v45  ;;  %v1368_v49 = vadd.f32 %v1336_v44, %v1195_v34 }
 0x230   : > { %2490 = vmatmul.msk.bf16.gmra.mxu2 %vm1079_vm1, %v1515_v46 }
 0x231   : > { %v1273_v54 = vmul.f32 0.044715, %v1198_v33  ;;  %v1400_v50 = vmul.f32 0.7978846, %v1368_v49  ;;  %v2686_v37 = vpop.eup %2685  ;;  %v1241_v14 = vmul.f32 0.5, %v1198_v33 }
 0x232   : > { %v1463_v30 = vadd.f32 1.0, %v2686_v37 }
 0x233   : > { %v1305_v51 = vmul.f32 %v1273_v54, %v1198_v33  ;;  %v3447_v52 = vpop.f32.mrf.mxu2  ;;  %2687 = vtanh.f32 %v1400_v50 }
 0x234   : > { %v1495_v6 = vmul.f32 %v1463_v30, %v1239_v62 }
 0x235   : > { %v1337_v53 = vmul.f32 %v1305_v51, %v1198_v33 }
 0x236   : > { %v1199_v55 = vpop.f32.mrf.mxu1 }
 0x237   : > { %v1369_v57 = vadd.f32 %v1337_v53, %v1198_v33  ;;  %v1200_v43 = vadd.f32 %v3229_v47, %v1199_v55  ;;  %v3455_v47 = vld [vmem:[%s3917_s4] ss:$0 sm:$0xff] }
 0x239   : > { %v2688_v59 = vpop.eup %2687  ;;  %v1274_v60 = vmul.f32 0.044715, %v1200_v43  ;;  %v1401_v1 = vmul.f32 0.7978846, %v1369_v57  ;;  %v1242_v26 = vmul.f32 0.5, %v1200_v43 }
 0x23a   : > { %v1464_v0 = vadd.f32 1.0, %v2688_v59 }
 0x23b   : > { %v1306_v3 = vmul.f32 %v1274_v60, %v1200_v43  ;;  %v3450_v4 = vpop.f32.mrf.mxu2  ;;  %2689 = vtanh.f32 %v1401_v1 }
 0x23c   : > { %v1496_v7 = vmul.f32 %v1464_v0, %v1240_v48 }
 0x23d   : > { %v1338_v10 = vmul.f32 %v1306_v3, %v1200_v43 }
 0x23e   : > { %v1202_v11 = vpop.f32.mrf.mxu1  ;;  %v1516_v58 = vpack.c.bf16 %v1496_v7, %v1495_v6 }
 0x23f   : > { %v1370_v13 = vadd.f32 %v1338_v10, %v1200_v43  ;;  %v1203_v63 = vadd.f32 %v3455_v47, %v1202_v11 }
 0x240   : > { %2491 = vmatmul.msk.bf16.gmra.mxu2 %vm1079_vm1, %v1516_v58 }
 0x241   : > { %v1402_v15 = vmul.f32 0.7978846, %v1370_v13  ;;  %v1275_v9 = vmul.f32 0.044715, %v1203_v63  ;;  %v2690_v20 = vpop.eup %2689  ;;  %v1243_v33 = vmul.f32 0.5, %v1203_v63 }
 0x242   : > { %v1465_v8 = vadd.f32 1.0, %v2690_v20  ;;  %v2029_v20 = vld [vmem:[%s3920_s7 + $0x78] sm:$0xff] }
 0x243   : > { %v1307_v16 = vmul.f32 %v1275_v9, %v1203_v63  ;;  %v3459_v19 = vpop.f32.mrf.mxu2  ;;  %2691 = vtanh.f32 %v1402_v15  ;;  %2034 = vmatpush.msrb.mxu3 %v2029_v20 }
 0x244   : > { %v1497_v35 = vmul.f32 %v1465_v8, %v1241_v14 }
 0x245   : > { %v1339_v21 = vmul.f32 %v1307_v16, %v1203_v63 }
 0x246   : > { %v1204_v23 = vpop.f32.mrf.mxu1 }
 0x247   : > { %v1371_v24 = vadd.f32 %v1339_v21, %v1203_v63  ;;  %v1205_v18 = vadd.f32 %v3455_v47, %v1204_v23 }
 0x249   : > { %v2692_v25 = vpop.eup %2691  ;;  %v1276_v56 = vmul.f32 0.044715, %v1205_v18  ;;  %v1403_v29 = vmul.f32 0.7978846, %v1371_v24  ;;  %v1244_v49 = vmul.f32 0.5, %v1205_v18 }
 0x24a   : > { %v1466_v28 = vadd.f32 1.0, %v2692_v25 }
 0x24b   : > { %v1308_v31 = vmul.f32 %v1276_v56, %v1205_v18  ;;  %v3462_v34 = vpop.f32.mrf.mxu2  ;;  %2693 = vtanh.f32 %v1403_v29 }
 0x24c   : > { %v1498_v36 = vmul.f32 %v1466_v28, %v1242_v26 }
 0x24d   : > { %v1340_v32 = vmul.f32 %v1308_v31, %v1205_v18 }
 0x24e   : > { %v1517_v38 = vpack.c.bf16 %v1498_v36, %v1497_v35  ;;  %v2026_v36 = vld [vmem:[%s3920_s7 + $0x60] sm:$0xff] }
 0x24f   : > { %v1372_v39 = vadd.f32 %v1340_v32, %v1205_v18  ;;  %v2028_v18 = vld [vmem:[%s3920_s7 + $0x70] sm:$0xff] }
 0x250   : > { %2492 = vmatmul.msk.bf16.gmra.mxu2 %vm1079_vm1, %v1517_v38  ;;  %2035 = vmatpush.msrb.mxu3 %v2028_v18 }
 0x251   : > { %v1404_v40 = vmul.f32 0.7978846, %v1372_v39  ;;  %v2694_v42 = vpop.eup %2693  ;;  %v2025_v39 = vld [vmem:[%s3920_s7 + $0x58] sm:$0xff] }
 0x252   : > { %v1467_v44 = vadd.f32 1.0, %v2694_v42  ;;  %v2023_v42 = vld [vmem:[%s3920_s7 + $0x48] sm:$0xff] }
 0x253   : > { %v3465_v12 = vpop.f32.mrf.mxu2  ;;  %2695 = vtanh.f32 %v1404_v40 }
 0x254   : > { %v1207_v41 = vpop.f32.mrf.mxu3  ;;  %v1499_v53 = vmul.f32 %v1467_v44, %v1243_v33  ;;  %v2022_v44 = vld [vmem:[%s3920_s7 + $0x40] sm:$0xff]  ;;  %v2020_v33 = vld [vmem:[%s3920_s7 + $0x30] sm:$0xff] }
 0x255   : > { %v1208_v22 = vadd.f32 %v3455_v47, %v1207_v41  ;;  %v2024_v41 = vld [vmem:[%s3920_s7 + $0x50] sm:$0xff] }
 0x257   : > { %v1277_v61 = vmul.f32 0.044715, %v1208_v22  ;;  %v1245_v8 = vmul.f32 0.5, %v1208_v22 }
 0x259   : > { %v2696_v45 = vpop.eup %2695  ;;  %v1309_v46 = vmul.f32 %v1277_v61, %v1208_v22 }
 0x25a   : > { %v1468_v54 = vadd.f32 1.0, %v2696_v45  ;;  %v2021_v45 = vld [vmem:[%s3920_s7 + $0x38] sm:$0xff] }
 0x25b   : > { %v1341_v50 = vmul.f32 %v1309_v46, %v1208_v22  ;;  %v3468_v51 = vpop.f32.mrf.mxu2 }
 0x25c   : > { %v1209_v37 = vpop.f32.mrf.mxu3  ;;  %v1500_v55 = vmul.f32 %v1468_v54, %v1244_v49  ;;  %v3516_v54 = vld [vmem:[%s3919_s6] ss:$0 sm:$0xff] }
 0x25d   : > { %v1373_v57 = vadd.f32 %v1341_v50, %v1208_v22  ;;  %v1210_v43 = vadd.f32 %v3455_v47, %v1209_v37  ;;  %v3551_v20 = vadd.f32 %v3516_v54, %v3440_v27 }
 0x25e   : > { %v1518_v30 = vpack.c.bf16 %v1500_v55, %v1499_v53  ;;  %v2019_v55 = vld [vmem:[%s3920_s7 + $0x28] sm:$0xff] }
 0x25f   : > { %v1278_v59 = vmul.f32 0.044715, %v1210_v43  ;;  %v1405_v60 = vmul.f32 0.7978846, %v1373_v57  ;;  %v1246_v25 = vmul.f32 0.5, %v1210_v43 }
 0x260   : > { %2493 = vmatmul.msk.bf16.gmra.mxu2 %vm1079_vm1, %v1518_v30  ;;  %v1615_v30 = vadd.f32 %v3516_v54, %v3433_v2  ;;  %v1728_v18 = vmul.f32 0.044715, %v3551_v20 }
 0x261   : > { %v1310_v62 = vmul.f32 %v1278_v59, %v1210_v43  ;;  %2697 = vtanh.f32 %v1405_v60  ;;  %v2018_v60 = vld [vmem:[%s3920_s7 + $0x20] sm:$0xff] }
 0x262   : > { %v1726_v2 = vmul.f32 0.044715, %v1615_v30 }
 0x263   : > { %v1342_v48 = vmul.f32 %v1310_v62, %v1210_v43  ;;  %v3472_v0 = vpop.f32.mrf.mxu2 }
 0x264   : > { %v1212_v1 = vpop.f32.mrf.mxu3 }
 0x265   : > { %v1374_v3 = vadd.f32 %v1342_v48, %v1210_v43  ;;  %v1213_v6 = vadd.f32 %v3455_v47, %v1212_v1  ;;  %v2017_v48 = vld [vmem:[%s3920_s7 + $0x18] sm:$0xff]  ;;  %v2016_v1 = vld [vmem:[%s3920_s7 + $0x10] sm:$0xff] }
 0x267   : > { %v1406_v7 = vmul.f32 0.7978846, %v1374_v3  ;;  %v1279_v10 = vmul.f32 0.044715, %v1213_v6  ;;  %v2698_v58 = vpop.eup %2697  ;;  %v1247_v50 = vmul.f32 0.5, %v1213_v6  ;;  %v2015_v3 = vld [vmem:[%s3920_s7 + $0x8] sm:$0xff] }
 0x268   : > { %v1469_v21 = vadd.f32 1.0, %v2698_v58 }
 0x269   : > { %2699 = vtanh.f32 %v1406_v7  ;;  %v1311_v11 = vmul.f32 %v1279_v10, %v1213_v6  ;;  %v3540_v7 = vadd.f32 %v3516_v54, %v3436_v17 }
 0x26a   : > { %v1501_v28 = vmul.f32 %v1469_v21, %v1245_v8 }
 0x26b   : > { %v3475_v13 = vpop.f32.mrf.mxu2  ;;  %v1343_v63 = vmul.f32 %v1311_v11, %v1213_v6  ;;  %v2014_v11 = vld [vmem:[%s3920_s7] sm:$0xff] }
 0x26c   : > { %v1214_v15 = vpop.f32.mrf.mxu3 }
 0x26d   : > { %v1215_v9 = vadd.f32 %v3455_v47, %v1214_v15  ;;  %v1375_v16 = vadd.f32 %v1343_v63, %v1213_v6  ;;  %v2027_v47 = vld [vmem:[%s3920_s7 + $0x68] sm:$0xff]  ;;  %v1758_v6 = vmul.f32 %v1726_v2, %v1615_v30  ;;  %v1727_v63 = vmul.f32 0.044715, %v3540_v7 }
 0x26e   : > { %2036 = vmatpush.msrb.mxu3 %v2027_v47 }
 0x26f   : > { %v2700_v23 = vpop.eup %2699  ;;  %v1280_v24 = vmul.f32 0.044715, %v1215_v9  ;;  %v1407_v26 = vmul.f32 0.7978846, %v1375_v16  ;;  %v1248_v37 = vmul.f32 0.5, %v1215_v9  ;;  %v1790_v58 = vmul.f32 %v1758_v6, %v1615_v30 }
 0x270   : > { %v1470_v56 = vadd.f32 1.0, %v2700_v23  ;;  %2037 = vmatpush.msrb.mxu3 %v2026_v36  ;;  %v1759_v16 = vmul.f32 %v1727_v63, %v3540_v7  ;;  %v3577_v6 = vadd.f32 %v3516_v54, %v3450_v4 }
 0x271   : > { %v1312_v14 = vmul.f32 %v1280_v24, %v1215_v9  ;;  %2701 = vtanh.f32 %v1407_v26  ;;  %v1822_v15 = vadd.f32 %v1790_v58, %v1615_v30 }
 0x272   : > { %v1502_v29 = vmul.f32 %v1470_v56, %v1246_v25  ;;  %2038 = vmatpush.msrb.mxu3 %v2025_v39  ;;  %v1791_v24 = vmul.f32 %v1759_v16, %v3540_v7 }
 0x273   : > { %v3487_v31 = vpop.f32.mrf.mxu2  ;;  %v1344_v35 = vmul.f32 %v1312_v14, %v1215_v9  ;;  %v1854_v23 = vmul.f32 0.7978846, %v1822_v15  ;;  %v3559_v14 = vadd.f32 %v3516_v54, %v3443_v5  ;;  %v3567_v5 = vadd.f32 %v3516_v54, %v3447_v52 }
 0x274   : > { %v1519_v32 = vpack.c.bf16 %v1502_v29, %v1501_v28  ;;  %2039 = vmatpush.msrb.mxu3 %v2024_v41  ;;  %v1823_v47 = vadd.f32 %v1791_v24, %v3540_v7  ;;  %v1760_v28 = vmul.f32 %v1728_v18, %v3551_v20  ;;  %v1731_v24 = vmul.f32 0.044715, %v3577_v6 }
 0x275   : > { %v1376_v38 = vadd.f32 %v1344_v35, %v1215_v9  ;;  %v1729_v39 = vmul.f32 0.044715, %v3559_v14 }
 0x276   : > { %2494 = vmatmul.msk.bf16.vlgmr.msra.gmra.mxu3 %vm1079_vm1, %v1519_v32  ;;  %v1855_v36 = vmul.f32 0.7978846, %v1823_v47 }
 0x277   : > { %v1408_v40 = vmul.f32 0.7978846, %v1376_v38  ;;  %v2702_v22 = vpop.eup %2701  ;;  %2040 = vmatpush.msrb.mxu3 %v2023_v42  ;;  %v1792_v38 = vmul.f32 %v1760_v28, %v3551_v20 }
 0x278   : > { %v1471_v46 = vadd.f32 1.0, %v2702_v22 }
 0x279   : > { %2703 = vtanh.f32 %v1408_v40  ;;  %2041 = vmatpush.msrb.mxu3 %v2022_v44 }
 0x27a   : > { %v1503_v57 = vmul.f32 %v1471_v46, %v1247_v50  ;;  %2705 = vtanh.f32 %v1854_v23  ;;  %v1761_v46 = vmul.f32 %v1729_v39, %v3559_v14 }
 0x27b   : > { %v3502_v61 = vpop.f32.mrf.mxu2  ;;  %2042 = vmatpush.msrb.mxu3 %v2021_v45  ;;  %v1824_v45 = vadd.f32 %v1792_v38, %v3551_v20  ;;  %v1763_v38 = vmul.f32 %v1731_v24, %v3577_v6 }
 0x27d   : > { %2043 = vmatpush.msrb.mxu3 %v2020_v33 }
 0x27f   : > { %v2704_v49 = vpop.eup %2703  ;;  %2044 = vmatpush.msrb.mxu3 %v2019_v55  ;;  %v1694_v55 = vmul.f32 0.5, %v1615_v30 }
 0x280   : > { %v1472_v53 = vadd.f32 1.0, %v2704_v49  ;;  %v2706_v40 = vpop.eup %2705 }
 0x281   : > { %2045 = vmatpush.msrb.mxu3 %v2018_v60  ;;  %v1918_v33 = vadd.f32 1.0, %v2706_v40  ;;  %v1856_v60 = vmul.f32 0.7978846, %v1824_v45  ;;  %v1696_v45 = vmul.f32 0.5, %v3551_v20 }
 0x282   : > { %v1504_v43 = vmul.f32 %v1472_v53, %v1248_v37  ;;  %v1730_v53 = vmul.f32 0.044715, %v3567_v5 }
 0x283   : > { %v3523_v59 = vpop.f32.mrf.mxu2  ;;  %2046 = vmatpush.msrb.mxu3 %v2017_v48 }
 0x284   : > { %v1520_v62 = vpack.c.bf16 %v1504_v43, %v1503_v57  ;;  %v1762_v30 = vmul.f32 %v1730_v53, %v3567_v5 }
 0x285   : > { %2047 = vmatpush.msrb.mxu3 %v2016_v1  ;;  %v1950_v1 = vmul.f32 %v1918_v33, %v1694_v55 }
 0x286   : > { %2495 = vmatmul.msk.bf16.gmra.mxu3 %vm1079_vm1, %v1520_v62  ;;  %v1793_v62 = vmul.f32 %v1761_v46, %v3559_v14 }
 0x287   : > { %2048 = vmatpush.msrb.mxu3 %v2015_v3 }
 0x289   : > { %2049 = vmatpush.msrb.mxu3 %v2014_v11 }
 0x28b   : > { %v3542_v10 = vpop.f32.mrf.mxu2 }
 0x293   : > { %v1654_v9 = vpop.f32.mrf.mxu2 }
 0x294   : > { %v1655_v17 = vadd.f32 %v3516_v54, %v1654_v9  ;;  %v1825_v9 = vadd.f32 %v1793_v62, %v3559_v14 }
 0x296   : > { %v1742_v21 = vmul.f32 0.044715, %v1655_v17  ;;  %v1710_v57 = vmul.f32 0.5, %v1655_v17  ;;  %v1857_v47 = vmul.f32 0.7978846, %v1825_v9 }
 0x298   : > { %v1774_v8 = vmul.f32 %v1742_v21, %v1655_v17  ;;  %v1695_v21 = vmul.f32 0.5, %v3540_v7 }
 0x29a   : > { %v1806_v25 = vmul.f32 %v1774_v8, %v1655_v17 }
 0x29b   : > { %v1656_v56 = vpop.f32.mrf.mxu2 }
 0x29c   : > { %v1838_v27 = vadd.f32 %v1806_v25, %v1655_v17  ;;  %v1657_v26 = vadd.f32 %v3516_v54, %v1656_v56  ;;  %v1794_v25 = vmul.f32 %v1762_v30, %v3567_v5 }
 0x29e   : > { %v1870_v29 = vmul.f32 0.7978846, %v1838_v27  ;;  %v1743_v35 = vmul.f32 0.044715, %v1657_v26  ;;  %v1711_v18 = vmul.f32 0.5, %v1657_v26  ;;  %v1826_v7 = vadd.f32 %v1794_v25, %v3567_v5 }
 0x29f   : > { %v3621_v25 = vadd.f32 %v3516_v54, %v3465_v12  ;;  %v1698_v12 = vmul.f32 0.5, %v3567_v5 }
 0x2a0   : > { %2707 = vtanh.f32 %v1870_v29  ;;  %v1775_v32 = vmul.f32 %v1743_v35, %v1657_v26 }
 0x2a1   : > { %2709 = vtanh.f32 %v1855_v36 }
 0x2a2   : > { %v1807_v41 = vmul.f32 %v1775_v32, %v1657_v26 }
 0x2a3   : > { %v1659_v42 = vpop.f32.mrf.mxu2 }
 0x2a4   : > { %v1660_v22 = vadd.f32 %v3516_v54, %v1659_v42  ;;  %v1839_v44 = vadd.f32 %v1807_v41, %v1657_v26  ;;  %v3599_v26 = vadd.f32 %v3516_v54, %v3459_v19 }
 0x2a6   : > { %v2708_v49 = vpop.eup %2707  ;;  %v1744_v50 = vmul.f32 0.044715, %v1660_v22  ;;  %v1871_v37 = vmul.f32 0.7978846, %v1839_v44  ;;  %v1712_v33 = vmul.f32 0.5, %v1660_v22 }
 0x2a7   : > { %v1934_v52 = vadd.f32 1.0, %v2708_v49  ;;  %v2710_v48 = vpop.eup %2709  ;;  %v1732_v19 = vmul.f32 0.044715, %v3599_v26 }
 0x2a8   : > { %2711 = vtanh.f32 %v1871_v37  ;;  %v1776_v43 = vmul.f32 %v1744_v50, %v1660_v22  ;;  %v1919_v16 = vadd.f32 1.0, %v2710_v48  ;;  %v1858_v50 = vmul.f32 0.7978846, %v1826_v7 }
 0x2a9   : > { %v1966_v2 = vmul.f32 %v1934_v52, %v1710_v57  ;;  %2713 = vtanh.f32 %v1856_v60  ;;  %v1795_v37 = vmul.f32 %v1763_v38, %v3577_v6  ;;  %v1734_v7 = vmul.f32 0.044715, %v3621_v25 }
 0x2aa   : > { %v1808_v3 = vmul.f32 %v1776_v43, %v1660_v22  ;;  %v1951_v27 = vmul.f32 %v1919_v16, %v1695_v21 }
 0x2ab   : > { %v1661_v11 = vpop.f32.mrf.mxu2  ;;  %v1982_v58 = vmax.f32 %v1950_v1, %v1966_v2  ;;  %v1827_v20 = vadd.f32 %v1795_v37, %v3577_v6  ;;  %v1764_v2 = vmul.f32 %v1732_v19, %v3599_v26  ;;  %v1766_v5 = vmul.f32 %v1734_v7, %v3621_v25 }
 0x2ac   : > { %v3581_v63 = vadd.f32 %v3516_v54, %v1661_v11  ;;  %v1840_v15 = vadd.f32 %v1808_v3, %v1660_v22  ;;  %v3610_v22 = vadd.f32 %v3516_v54, %v3462_v34 }
 0x2ad   : > { %1998 = vst [vmem:[%s3586_s28] sm:$0xff] %v1982_v58  ;;  %2050 = vmatmul.f32.vlgmr.msrb.gmra.mxu3 %v1982_v58  ;;  %v1796_v21 = vmul.f32 %v1764_v2, %v3599_v26  ;;  %v1798_v2 = vmul.f32 %v1766_v5, %v3621_v25 }
 0x2ae   : > { %v2712_v4 = vpop.eup %2711  ;;  %v1745_v17 = vmul.f32 0.044715, %v3581_v63  ;;  %v1872_v23 = vmul.f32 0.7978846, %v1840_v15  ;;  %v1697_v15 = vmul.f32 0.5, %v3559_v14  ;;  %v1713_v9 = vmul.f32 0.5, %v3581_v63 }
 0x2af   : > { %v1935_v8 = vadd.f32 1.0, %v2712_v4  ;;  %v2714_v29 = vpop.eup %2713  ;;  %v1859_v4 = vmul.f32 0.7978846, %v1827_v20  ;;  %v1733_v34 = vmul.f32 0.044715, %v3610_v22 }
 0x2b0   : > { %2715 = vtanh.f32 %v1872_v23  ;;  %v1777_v56 = vmul.f32 %v1745_v17, %v3581_v63  ;;  %v1920_v41 = vadd.f32 1.0, %v2714_v29 }
 0x2b1   : > { %v1967_v28 = vmul.f32 %v1935_v8, %v1711_v18  ;;  %2717 = vtanh.f32 %v1857_v47 }
 0x2b2   : > { %v1809_v35 = vmul.f32 %v1777_v56, %v3581_v63  ;;  %v1952_v55 = vmul.f32 %v1920_v41, %v1696_v45 }
 0x2b3   : > { %v1664_v36 = vpop.f32.mrf.mxu2  ;;  %v1983_v32 = vmax.f32 %v1951_v27, %v1967_v28  ;;  %v1828_v27 = vadd.f32 %v1796_v21, %v3599_v26  ;;  %v1765_v28 = vmul.f32 %v1733_v34, %v3610_v22  ;;  %v1830_v34 = vadd.f32 %v1798_v2, %v3621_v25 }
 0x2b4   : > { %v1665_v39 = vadd.f32 %v3516_v54, %v1664_v36  ;;  %v1841_v40 = vadd.f32 %v1809_v35, %v3581_v63 }
 0x2b5   : > { %1999 = vst [vmem:[%s3586_s28 + $0x8] sm:$0xff] %v1983_v32  ;;  %2053 = vmatmul.f32.gmra.mxu3 %v1983_v32 }
 0x2b6   : > { %v2716_v42 = vpop.eup %2715  ;;  %v1746_v44 = vmul.f32 0.044715, %v1665_v39  ;;  %v1873_v46 = vmul.f32 0.7978846, %v1841_v40  ;;  %v1714_v38 = vmul.f32 0.5, %v1665_v39 }
 0x2b7   : > { %v1936_v49 = vadd.f32 1.0, %v2716_v42  ;;  %v2718_v52 = vpop.eup %2717  ;;  %v1860_v42 = vmul.f32 0.7978846, %v1828_v27  ;;  %v1862_v27 = vmul.f32 0.7978846, %v1830_v34 }
 0x2b8   : > { %2719 = vtanh.f32 %v1873_v46  ;;  %v1778_v53 = vmul.f32 %v1746_v44, %v1665_v39  ;;  %v1921_v3 = vadd.f32 1.0, %v2718_v52  ;;  %v1797_v44 = vmul.f32 %v1765_v28, %v3610_v22 }
 0x2b9   : > { %v1968_v57 = vmul.f32 %v1936_v49, %v1712_v33  ;;  %2721 = vtanh.f32 %v1858_v50  ;;  %v3632_v50 = vadd.f32 %v3516_v54, %v3468_v51 }
 0x2ba   : > { %v1810_v43 = vmul.f32 %v1778_v53, %v1665_v39  ;;  %v1953_v24 = vmul.f32 %v1921_v3, %v1697_v15 }
 0x2bb   : > { %v1666_v60 = vpop.f32.mrf.mxu2  ;;  %v1984_v62 = vmax.f32 %v1952_v55, %v1968_v57  ;;  %v1829_v55 = vadd.f32 %v1797_v44, %v3610_v22  ;;  %v1735_v51 = vmul.f32 0.044715, %v3632_v50 }
 0x2bc   : > { %v1667_v48 = vadd.f32 %v3516_v54, %v1666_v60  ;;  %v1842_v1 = vadd.f32 %v1810_v43, %v1665_v39  ;;  %v1699_v60 = vmul.f32 0.5, %v3577_v6 }
 0x2bd   : > { %2000 = vst [vmem:[%s3586_s28 + $0x10] sm:$0xff] %v1984_v62  ;;  %2056 = vmatmul.f32.gmra.mxu3 %v1984_v62  ;;  %v1767_v6 = vmul.f32 %v1735_v51, %v3632_v50 }
 0x2be   : > { %v2720_v11 = vpop.eup %2719  ;;  %v1747_v58 = vmul.f32 0.044715, %v1667_v48  ;;  %v1874_v30 = vmul.f32 0.7978846, %v1842_v1  ;;  %v1715_v20 = vmul.f32 0.5, %v1667_v48 }
 0x2bf   : > { %v1937_v16 = vadd.f32 1.0, %v2720_v11  ;;  %v2722_v23 = vpop.eup %2721  ;;  %v1861_v11 = vmul.f32 0.7978846, %v1829_v55  ;;  %v1799_v28 = vmul.f32 %v1767_v6, %v3632_v50 }
 0x2c0   : > { %2723 = vtanh.f32 %v1874_v30  ;;  %v1779_v17 = vmul.f32 %v1747_v58, %v1667_v48  ;;  %v1922_v29 = vadd.f32 1.0, %v2722_v23 }
 0x2c1   : > { %v1969_v18 = vmul.f32 %v1937_v16, %v1713_v9  ;;  %2725 = vtanh.f32 %v1859_v4 }
 0x2c2   : > { %v1811_v8 = vmul.f32 %v1779_v17, %v1667_v48  ;;  %v1954_v46 = vmul.f32 %v1922_v29, %v1698_v12 }
 0x2c3   : > { %v1669_v14 = vpop.f32.mrf.mxu2  ;;  %v1985_v56 = vmax.f32 %v1953_v24, %v1969_v18 }
 0x2c4   : > { %v1670_v63 = vadd.f32 %v3516_v54, %v1669_v14  ;;  %v1843_v47 = vadd.f32 %v1811_v8, %v1667_v48  ;;  %v3645_v48 = vadd.f32 %v3516_v54, %v3472_v0  ;;  %v1700_v8 = vmul.f32 0.5, %v3599_v26 }
 0x2c5   : > { %2001 = vst [vmem:[%s3586_s28 + $0x18] sm:$0xff] %v1985_v56  ;;  %2059 = vmatmul.f32.gmra.mxu3 %v1985_v56  ;;  %v1831_v26 = vadd.f32 %v1799_v28, %v3632_v50 }
 0x2c6   : > { %v2724_v35 = vpop.eup %2723  ;;  %v1748_v36 = vmul.f32 0.044715, %v1670_v63  ;;  %v1875_v32 = vmul.f32 0.7978846, %v1843_v47  ;;  %v1716_v56 = vmul.f32 0.5, %v1670_v63 }
 0x2c7   : > { %v1938_v40 = vadd.f32 1.0, %v2724_v35  ;;  %v2726_v45 = vpop.eup %2725  ;;  %v1736_v0 = vmul.f32 0.044715, %v3645_v48  ;;  %v1863_v5 = vmul.f32 0.7978846, %v1831_v26 }
 0x2c8   : > { %2727 = vtanh.f32 %v1875_v32  ;;  %v1780_v41 = vmul.f32 %v1748_v36, %v1670_v63  ;;  %v1923_v57 = vadd.f32 1.0, %v2726_v45 }
 0x2c9   : > { %v1970_v33 = vmul.f32 %v1938_v40, %v1714_v38  ;;  %2729 = vtanh.f32 %v1860_v42  ;;  %v1768_v42 = vmul.f32 %v1736_v0, %v3645_v48 }
 0x2ca   : > { %v1812_v49 = vmul.f32 %v1780_v41, %v1670_v63  ;;  %v1955_v58 = vmul.f32 %v1923_v57, %v1699_v60 }
 0x2cb   : > { %v1671_v37 = vpop.f32.mrf.mxu2  ;;  %v1986_v19 = vmax.f32 %v1954_v46, %v1970_v33  ;;  %v1800_v55 = vmul.f32 %v1768_v42, %v3645_v48 }
 0x2cc   : > { %v1672_v39 = vadd.f32 %v3516_v54, %v1671_v37  ;;  %v1844_v53 = vadd.f32 %v1812_v49, %v1670_v63  ;;  %v3655_v63 = vadd.f32 %v3516_v54, %v3475_v13  ;;  %v1701_v49 = vmul.f32 0.5, %v3610_v22 }
 0x2cd   : > { %2002 = vst [vmem:[%s3586_s28 + $0x20] sm:$0xff] %v1986_v19  ;;  %2062 = vmatmul.f32.gmra.mxu3 %v1986_v19 }
 0x2ce   : > { %v2728_v52 = vpop.eup %2727  ;;  %v1749_v43 = vmul.f32 0.044715, %v1672_v39  ;;  %v1876_v62 = vmul.f32 0.7978846, %v1844_v53  ;;  %v1717_v37 = vmul.f32 0.5, %v1672_v39 }
 0x2cf   : > { %v1939_v1 = vadd.f32 1.0, %v2728_v52  ;;  %v2730_v15 = vpop.eup %2729  ;;  %v1737_v13 = vmul.f32 0.044715, %v3655_v63 }
 0x2d0   : > { %2731 = vtanh.f32 %v1876_v62  ;;  %v1781_v3 = vmul.f32 %v1749_v43, %v1672_v39  ;;  %v1924_v23 = vadd.f32 1.0, %v2730_v15 }
 0x2d1   : > { %v1971_v30 = vmul.f32 %v1939_v1, %v1715_v20  ;;  %2733 = vtanh.f32 %v1861_v11  ;;  %v1769_v1 = vmul.f32 %v1737_v13, %v3655_v63 }
 0x2d2   : > { %v1813_v9 = vmul.f32 %v1781_v3, %v1672_v39  ;;  %v1956_v35 = vmul.f32 %v1924_v23, %v1700_v8 }
 0x2d3   : > { %v1674_v16 = vpop.f32.mrf.mxu2  ;;  %v1987_v4 = vmax.f32 %v1955_v58, %v1971_v30  ;;  %v1702_v30 = vmul.f32 0.5, %v3621_v25  ;;  %v1801_v34 = vmul.f32 %v1769_v1, %v3655_v63 }
 0x2d4   : > { %v1675_v17 = vadd.f32 %v3516_v54, %v1674_v16  ;;  %v1845_v21 = vadd.f32 %v1813_v9, %v1672_v39  ;;  %v1832_v39 = vadd.f32 %v1800_v55, %v3645_v48 }
 0x2d5   : > { %2003 = vst [vmem:[%s3586_s28 + $0x28] sm:$0xff] %v1987_v4  ;;  %2065 = vmatmul.f32.gmra.mxu3 %v1987_v4 }
 0x2d6   : > { %v2732_v24 = vpop.eup %2731  ;;  %v1750_v18 = vmul.f32 0.044715, %v1675_v17  ;;  %v1877_v14 = vmul.f32 0.7978846, %v1845_v21  ;;  %v1718_v15 = vmul.f32 0.5, %v1675_v17  ;;  %v3671_v21 = vadd.f32 %v3516_v54, %v3487_v31 }
 0x2d7   : > { %v1940_v47 = vadd.f32 1.0, %v2732_v24  ;;  %v2734_v32 = vpop.eup %2733  ;;  %v1864_v4 = vmul.f32 0.7978846, %v1832_v39 }
 0x2d8   : > { %2735 = vtanh.f32 %v1877_v14  ;;  %v1782_v29 = vmul.f32 %v1750_v18, %v1675_v17  ;;  %v1925_v44 = vadd.f32 1.0, %v2734_v32 }
 0x2d9   : > { %v1972_v36 = vmul.f32 %v1940_v47, %v1716_v56  ;;  %2737 = vtanh.f32 %v1862_v27  ;;  %v1833_v56 = vadd.f32 %v1801_v34, %v3655_v63  ;;  %v1738_v47 = vmul.f32 0.044715, %v3671_v21 }
 0x2da   : > { %v1814_v7 = vmul.f32 %v1782_v29, %v1675_v17  ;;  %v1957_v52 = vmul.f32 %v1925_v44, %v1701_v49  ;;  %v1703_v29 = vmul.f32 0.5, %v3632_v50 }
 0x2db   : > { %v1676_v12 = vpop.f32.mrf.mxu2  ;;  %v1988_v38 = vmax.f32 %v1956_v35, %v1972_v36 }
 0x2dc   : > { %v1677_v40 = vadd.f32 %v3516_v54, %v1676_v12  ;;  %v1846_v41 = vadd.f32 %v1814_v7, %v1675_v17  ;;  %v1865_v7 = vmul.f32 0.7978846, %v1833_v56  ;;  %v3680_v12 = vadd.f32 %v3516_v54, %v3502_v61 }
 0x2dd   : > { %2004 = vst [vmem:[%s3586_s28 + $0x30] sm:$0xff] %v1988_v38  ;;  %2068 = vmatmul.f32.gmra.mxu3 %v1988_v38 }
 0x2de   : > { %v2736_v45 = vpop.eup %2735  ;;  %v1751_v46 = vmul.f32 0.044715, %v1677_v40  ;;  %v1878_v33 = vmul.f32 0.7978846, %v1846_v41  ;;  %v1719_v35 = vmul.f32 0.5, %v1677_v40  ;;  %v1770_v41 = vmul.f32 %v1738_v47, %v3671_v21 }
 0x2df   : > { %v1941_v19 = vadd.f32 1.0, %v2736_v45  ;;  %v2738_v57 = vpop.eup %2737  ;;  %v1739_v50 = vmul.f32 0.044715, %v3680_v12 }
 0x2e0   : > { %2739 = vtanh.f32 %v1878_v33  ;;  %v1783_v53 = vmul.f32 %v1751_v46, %v1677_v40  ;;  %v1926_v2 = vadd.f32 1.0, %v2738_v57  ;;  %v1802_v33 = vmul.f32 %v1770_v41, %v3671_v21 }
 0x2e1   : > { %v1973_v43 = vmul.f32 %v1941_v19, %v1717_v37  ;;  %2741 = vtanh.f32 %v1863_v5  ;;  %v1704_v37 = vmul.f32 0.5, %v3645_v48 }
 0x2e2   : > { %v1815_v60 = vmul.f32 %v1783_v53, %v1677_v40  ;;  %v1958_v23 = vmul.f32 %v1926_v2, %v1702_v30  ;;  %v1834_v57 = vadd.f32 %v1802_v33, %v3671_v21 }
 0x2e3   : > { %v1679_v62 = vpop.f32.mrf.mxu2  ;;  %v1989_v51 = vmax.f32 %v1957_v52, %v1973_v43  ;;  %v1771_v52 = vmul.f32 %v1739_v50, %v3680_v12 }
 0x2e4   : > { %v1680_v20 = vadd.f32 %v3516_v54, %v1679_v62  ;;  %v1847_v22 = vadd.f32 %v1815_v60, %v1677_v40  ;;  %v3691_v60 = vadd.f32 %v3516_v54, %v3523_v59 }
 0x2e5   : > { %2005 = vst [vmem:[%s3586_s28 + $0x38] sm:$0xff] %v1989_v51  ;;  %2071 = vmatmul.f32.gmra.mxu3 %v1989_v51  ;;  %v1803_v39 = vmul.f32 %v1771_v52, %v3680_v12 }
 0x2e6   : > { %v2740_v3 = vpop.eup %2739  ;;  %v1752_v11 = vmul.f32 0.044715, %v1680_v20  ;;  %v1879_v58 = vmul.f32 0.7978846, %v1847_v22  ;;  %v1720_v19 = vmul.f32 0.5, %v1680_v20 }
 0x2e7   : > { %v1942_v9 = vadd.f32 1.0, %v2740_v3  ;;  %v2742_v6 = vpop.eup %2741  ;;  %v1740_v2 = vmul.f32 0.044715, %v3691_v60 }
 0x2e8   : > { %2743 = vtanh.f32 %v1879_v58  ;;  %v1784_v16 = vmul.f32 %v1752_v11, %v1680_v20  ;;  %v1927_v27 = vadd.f32 1.0, %v2742_v6  ;;  %v1705_v11 = vmul.f32 0.5, %v3655_v63 }
 0x2e9   : > { %v1974_v24 = vmul.f32 %v1942_v9, %v1718_v15  ;;  %2745 = vtanh.f32 %v1864_v4  ;;  %v1835_v4 = vadd.f32 %v1803_v39, %v3680_v12  ;;  %v1772_v34 = vmul.f32 %v1740_v2, %v3691_v60 }
 0x2ea   : > { %v1816_v18 = vmul.f32 %v1784_v16, %v1680_v20  ;;  %v1959_v38 = vmul.f32 %v1927_v27, %v1703_v29  ;;  %v3702_v6 = vadd.f32 %v3516_v54, %v3542_v10 }
 0x2eb   : > { %v1681_v8 = vpop.f32.mrf.mxu2  ;;  %v1990_v14 = vmax.f32 %v1958_v23, %v1974_v24  ;;  %v1804_v56 = vmul.f32 %v1772_v34, %v3691_v60 }
 0x2ec   : > { %v1682_v25 = vadd.f32 %v3516_v54, %v1681_v8  ;;  %v1848_v17 = vadd.f32 %v1816_v18, %v1680_v20  ;;  %v1866_v20 = vmul.f32 0.7978846, %v1834_v57  ;;  %v1707_v57 = vmul.f32 0.5, %v3680_v12 }
 0x2ed   : > { %2006 = vst [vmem:[%s3586_s28 + $0x40] sm:$0xff] %v1990_v14  ;;  %2074 = vmatmul.f32.gmra.mxu3 %v1990_v14  ;;  %v1867_v14 = vmul.f32 0.7978846, %v1835_v4  ;;  %v1836_v29 = vadd.f32 %v1804_v56, %v3691_v60  ;;  %v1708_v12 = vmul.f32 0.5, %v3691_v60  ;;  %v2576_v60 = vld [vmem:[%s3921_s8] ss:$0 sm:$0xff] }
 0x2ee   : > { %v2744_v28 = vpop.eup %2743  ;;  %v1753_v0 = vmul.f32 0.044715, %v1682_v25  ;;  %v1880_v31 = vmul.f32 0.7978846, %v1848_v17  ;;  %v1721_v58 = vmul.f32 0.5, %v1682_v25 }
 0x2ef   : > { %v1943_v36 = vadd.f32 1.0, %v2744_v28  ;;  %v2746_v42 = vpop.eup %2745 }
 0x2f0   : > { %2747 = vtanh.f32 %v1880_v31  ;;  %v1785_v32 = vmul.f32 %v1753_v0, %v1682_v25  ;;  %v1928_v40 = vadd.f32 1.0, %v2746_v42 }
 0x2f1   : > { %v1975_v26 = vmul.f32 %v1943_v36, %v1719_v35  ;;  %2749 = vtanh.f32 %v1865_v7 }
 0x2f2   : > { %v1817_v44 = vmul.f32 %v1785_v32, %v1682_v25  ;;  %v1960_v53 = vmul.f32 %v1928_v40, %v1704_v37 }
 0x2f3   : > { %v1991_v45 = vmax.f32 %v1959_v38, %v1975_v26  ;;  %v1706_v38 = vmul.f32 0.5, %v3671_v21 }
 0x2f4   : > { %v1849_v46 = vadd.f32 %v1817_v44, %v1682_v25  ;;  %v1741_v25 = vmul.f32 0.044715, %v3702_v6  ;;  %v1868_v44 = vmul.f32 0.7978846, %v1836_v29 }
 0x2f5   : > { %2007 = vst [vmem:[%s3586_s28 + $0x48] sm:$0xff] %v1991_v45  ;;  %2077 = vmatmul.f32.gmra.mxu3 %v1991_v45 }
 0x2f6   : > { %v2748_v49 = vpop.eup %2747  ;;  %v1881_v61 = vmul.f32 0.7978846, %v1849_v46  ;;  %v1773_v10 = vmul.f32 %v1741_v25, %v3702_v6 }
 0x2f7   : > { %v1944_v5 = vadd.f32 1.0, %v2748_v49  ;;  %v2750_v43 = vpop.eup %2749 }
 0x2f8   : > { %2751 = vtanh.f32 %v1881_v61  ;;  %v1929_v48 = vadd.f32 1.0, %v2750_v43  ;;  %v1805_v45 = vmul.f32 %v1773_v10, %v3702_v6 }
 0x2f9   : > { %v1684_v13 = vpop.f32.mrf.mxu3  ;;  %v1976_v55 = vmul.f32 %v1944_v5, %v1720_v19  ;;  %2753 = vtanh.f32 %v1866_v20 }
 0x2fa   : > { %v1685_v62 = vadd.f32 %v3516_v54, %v1684_v13  ;;  %v1961_v9 = vmul.f32 %v1929_v48, %v1705_v11  ;;  %v1837_v21 = vadd.f32 %v1805_v45, %v3702_v6 }
 0x2fb   : > { %v1992_v51 = vmax.f32 %v1960_v53, %v1976_v55 }
 0x2fc   : > { %v1754_v22 = vmul.f32 0.044715, %v1685_v62  ;;  %v1722_v26 = vmul.f32 0.5, %v1685_v62 }
 0x2fd   : > { %2008 = vst [vmem:[%s3586_s28 + $0x50] sm:$0xff] %v1992_v51  ;;  %2080 = vmatmul.f32.gmra.mxu3 %v1992_v51  ;;  %v1869_v51 = vmul.f32 0.7978846, %v1837_v21 }
 0x2fe   : > { %v2752_v1 = vpop.eup %2751  ;;  %v1786_v3 = vmul.f32 %v1754_v22, %v1685_v62 }
 0x2ff   : > { %v1945_v59 = vadd.f32 1.0, %v2752_v1  ;;  %v2754_v47 = vpop.eup %2753 }
 0x300   : > { %v1818_v30 = vmul.f32 %v1786_v3, %v1685_v62  ;;  %v1930_v35 = vadd.f32 1.0, %v2754_v47 }
 0x301   : > { %v1686_v15 = vpop.f32.mrf.mxu3  ;;  %v1977_v16 = vmul.f32 %v1945_v59, %v1721_v58 }
 0x302   : > { %v1687_v23 = vadd.f32 %v3516_v54, %v1686_v15  ;;  %v1850_v24 = vadd.f32 %v1818_v30, %v1685_v62  ;;  %v1962_v50 = vmul.f32 %v1930_v35, %v1706_v38 }
 0x303   : > { %v1993_v63 = vmax.f32 %v1961_v9, %v1977_v16 }
 0x304   : > { %v1755_v18 = vmul.f32 0.044715, %v1687_v23  ;;  %v1882_v8 = vmul.f32 0.7978846, %v1850_v24  ;;  %v1723_v52 = vmul.f32 0.5, %v1687_v23 }
 0x305   : > { %2009 = vst [vmem:[%s3586_s28 + $0x58] sm:$0xff] %v1993_v63  ;;  %2083 = vmatmul.f32.gmra.mxu3 %v1993_v63 }
 0x306   : > { %2755 = vtanh.f32 %v1882_v8  ;;  %v1787_v17 = vmul.f32 %v1755_v18, %v1687_v23 }
 0x307   : > { %2757 = vtanh.f32 %v1867_v14 }
 0x308   : > { %v1819_v27 = vmul.f32 %v1787_v17, %v1687_v23 }
 0x309   : > { %v1689_v28 = vpop.f32.mrf.mxu3 }
 0x30a   : > { %v1690_v0 = vadd.f32 %v3516_v54, %v1689_v28  ;;  %v1851_v31 = vadd.f32 %v1819_v27, %v1687_v23  ;;  %v1709_v23 = vmul.f32 0.5, %v3702_v6 }
 0x30c   : > { %v2756_v36 = vpop.eup %2755  ;;  %v1756_v32 = vmul.f32 0.044715, %v1690_v0  ;;  %v1883_v7 = vmul.f32 0.7978846, %v1851_v31  ;;  %v1724_v58 = vmul.f32 0.5, %v1690_v0 }
 0x30d   : > { %v1946_v41 = vadd.f32 1.0, %v2756_v36  ;;  %v2758_v46 = vpop.eup %2757 }
 0x30e   : > { %v1788_v42 = vmul.f32 %v1756_v32, %v1690_v0  ;;  %2759 = vtanh.f32 %v1883_v7  ;;  %v1931_v5 = vadd.f32 1.0, %v2758_v46 }
 0x30f   : > { %v1978_v40 = vmul.f32 %v1946_v41, %v1722_v26  ;;  %2761 = vtanh.f32 %v1868_v44 }
 0x310   : > { %v1820_v33 = vmul.f32 %v1788_v42, %v1690_v0  ;;  %v1963_v22 = vmul.f32 %v1931_v5, %v1707_v57 }
 0x311   : > { %v1691_v49 = vpop.f32.mrf.mxu3  ;;  %v1994_v61 = vmax.f32 %v1962_v50, %v1978_v40 }
 0x312   : > { %v1692_v37 = vadd.f32 %v3516_v54, %v1691_v49  ;;  %v1852_v19 = vadd.f32 %v1820_v33, %v1690_v0 }
 0x313   : > { %2010 = vst [vmem:[%s3586_s28 + $0x60] sm:$0xff] %v1994_v61  ;;  %2086 = vmatmul.f32.gmra.mxu3 %v1994_v61 }
 0x314   : > { %v2760_v13 = vpop.eup %2759  ;;  %v1757_v53 = vmul.f32 0.044715, %v1692_v37  ;;  %v1884_v55 = vmul.f32 0.7978846, %v1852_v19  ;;  %v1725_v24 = vmul.f32 0.5, %v1692_v37 }
 0x315   : > { %v1947_v43 = vadd.f32 1.0, %v2760_v13  ;;  %v2762_v48 = vpop.eup %2761 }
 0x316   : > { %v1789_v62 = vmul.f32 %v1757_v53, %v1692_v37  ;;  %2763 = vtanh.f32 %v1884_v55  ;;  %v1932_v2 = vadd.f32 1.0, %v2762_v48 }
 0x317   : > { %v1979_v54 = vmul.f32 %v1947_v43, %v1723_v52  ;;  %2765 = vtanh.f32 %v1869_v51 }
 0x318   : > { %v1821_v20 = vmul.f32 %v1789_v62, %v1692_v37  ;;  %v1964_v30 = vmul.f32 %v1932_v2, %v1708_v12 }
 0x319   : > { %v1995_v39 = vmax.f32 %v1963_v22, %v1979_v54 }
 0x31a   : > { %v1853_v1 = vadd.f32 %v1821_v20, %v1692_v37 }
 0x31b   : > { %2011 = vst [vmem:[%s3586_s28 + $0x68] sm:$0xff] %v1995_v39  ;;  %2089 = vmatmul.f32.gmra.mxu3 %v1995_v39 }
 0x31c   : > { %v2764_v3 = vpop.eup %2763  ;;  %v1885_v11 = vmul.f32 0.7978846, %v1853_v1 }
 0x31d   : > { %v1948_v59 = vadd.f32 1.0, %v2764_v3  ;;  %v2766_v9 = vpop.eup %2765 }
 0x31e   : > { %2767 = vtanh.f32 %v1885_v11  ;;  %v1933_v4 = vadd.f32 1.0, %v2766_v9 }
 0x31f   : > { %v1980_v15 = vmul.f32 %v1948_v59, %v1724_v58 }
 0x320   : > { %v1965_v18 = vmul.f32 %v1933_v4, %v1709_v23 }
 0x321   : > { %v1996_v16 = vmax.f32 %v1964_v30, %v1980_v15 }
 0x323   : > { %2012 = vst [vmem:[%s3586_s28 + $0x70] sm:$0xff] %v1996_v16  ;;  %2092 = vmatmul.f32.gmra.mxu3 %v1996_v16 }
 0x324   : > { %v2768_v34 = vpop.eup %2767 }
 0x325   : > { %v1949_v63 = vadd.f32 1.0, %v2768_v34 }
 0x327   : > { %v1981_v8 = vmul.f32 %v1949_v63, %v1725_v24 }
 0x329   : > { %v1997_v14 = vmax.f32 %v1965_v18, %v1981_v8 }
 0x32b   : > { %2013 = vst [vmem:[%s3586_s28 + $0x78] sm:$0xff] %v1997_v14  ;;  %2095 = vmatmul.f32.gmra.mxu3 %v1997_v14 }
 0x330   : > { %v2051_v25 = vpop.f32.mrf.mxu3 }
 0x331   : > { %v2052_v17 = vadd.f32 %v2576_v60, %v2051_v25 }
 0x333   : > { %2099 = vmax.xlane.f32.xlu0 %v2052_v17 }
 0x338   : > { %v2054_v56 = vpop.f32.mrf.mxu3 }
 0x339   : > { %v2055_v47 = vadd.f32 %v2576_v60, %v2054_v56 }
 0x33b   : > { %2101 = vmax.xlane.f32.xlu0 %v2055_v47 }
 0x340   : > { %v2057_v27 = vpop.f32.mrf.mxu3 }
 0x341   : > { %v2058_v28 = vadd.f32 %v2576_v60, %v2057_v27 }
 0x343   : > { %2103 = vmax.xlane.f32.xlu1 %v2058_v28 }
 0x348   : > { %v2060_v6 = vpop.f32.mrf.mxu3 }
 0x349   : > { %v2061_v10 = vadd.f32 %v2576_v60, %v2060_v6 }
 0x34b   : > { %2105 = vmax.xlane.f32.xlu1 %v2061_v10 }
 0x350   : > { %v2063_v0 = vpop.f32.mrf.mxu3 }
 0x351   : > { %v2064_v31 = vadd.f32 %v2576_v60, %v2063_v0 }
 0x353   : > { %2107 = vmax.xlane.f32.xlu2 %v2064_v31 }
 0x358   : > { %v2066_v29 = vpop.f32.mrf.mxu3 }
 0x359   : > { %v3725_v35 = vadd.f32 %v2576_v60, %v2066_v29 }
 0x35b   : > { %2109 = vmax.xlane.f32.xlu2 %v3725_v35 }
 0x360   : > { %v2069_v36 = vpop.f32.mrf.mxu3 }
 0x361   : > { %v3728_v32 = vadd.f32 %v2576_v60, %v2069_v36 }
 0x363   : > { %2111 = vmax.xlane.f32.xlu0 %v3728_v32 }
 0x368   : > { %v2072_v7 = vpop.f32.mrf.mxu3 }
 0x369   : > { %v3731_v38 = vadd.f32 %v2576_v60, %v2072_v7 }
 0x36b   : > { %2113 = vmax.xlane.f32.xlu1 %v3731_v38 }
 0x370   : > { %v2075_v26 = vpop.f32.mrf.mxu3 }
 0x371   : > { %v3734_v41 = vadd.f32 %v2576_v60, %v2075_v26 }
 0x373   : > { %2115 = vmax.xlane.f32.xlu2 %v3734_v41 }
 0x378   : > { %v2078_v42 = vpop.f32.mrf.mxu3 }
 0x379   : > { %v3737_v44 = vadd.f32 %v2576_v60, %v2078_v42 }
 0x37b   : > { %2117 = vmax.xlane.f32.xlu0 %v3737_v44 }
 0x380   : > { %v2081_v45 = vpop.f32.mrf.mxu3 }
 0x381   : > { %v3740_v46 = vadd.f32 %v2576_v60, %v2081_v45 }
 0x383   : > { %2119 = vmax.xlane.f32.xlu1 %v3740_v46 }
 0x388   : > { %v2084_v50 = vpop.f32.mrf.mxu3 }
 0x389   : > { %v3743_v40 = vadd.f32 %v2576_v60, %v2084_v50 }
 0x38b   : > { %2121 = vmax.xlane.f32.xlu2 %v3743_v40 }
 0x396   : > { %v2087_v33 = vpop.f32.mrf.mxu3 }
 0x397   : > { %v3746_v49 = vadd.f32 %v2576_v60, %v2087_v33 }
 0x399   : > { %2123 = vmax.xlane.f32.xlu0 %v3746_v49 }
 0x39e   : > { %v2090_v61 = vpop.f32.mrf.mxu3 }
 0x39f   : > { %v3749_v37 = vadd.f32 %v2576_v60, %v2090_v61 }
 0x3a1   : > { %2125 = vmax.xlane.f32.xlu1 %v3749_v37 }
 0x3a6   : > { %v2093_v19 = vpop.f32.mrf.mxu3  ;;  %v2100_v21 = vpop.xlane.xlu0 %2099 }
 0x3a7   : > { %v3752_v5 = vadd.f32 %v2576_v60, %v2093_v19  ;;  %v2131_v13 = vsub.f32 %v2052_v17, %v2100_v21 }
 0x3a9   : > { %v2147_v53 = vmul.f32 1.442695, %v2131_v13  ;;  %2127 = vmax.xlane.f32.xlu2 %v3752_v5 }
 0x3ab   : > { %2769 = vpow2.f32 %v2147_v53 }
 0x3ae   : > { %v2096_v55 = vpop.f32.mrf.mxu3  ;;  %v2102_v57 = vpop.xlane.xlu0 %2101 }
 0x3af   : > { %v3755_v52 = vadd.f32 %v2576_v60, %v2096_v55  ;;  %v2132_v43 = vsub.f32 %v2055_v47, %v2102_v57 }
 0x3b1   : > { %v3757_v62 = vpop.eup %2769  ;;  %v2149_v51 = vmul.f32 1.442695, %v2132_v43  ;;  %2129 = vmax.xlane.f32.xlu0 %v3755_v52 }
 0x3b2   : > { %2179 = vadd.xlane.f32.xlu1 %v3757_v62 }
 0x3b3   : > { %2771 = vpow2.f32 %v2149_v51 }
 0x3b6   : > { %v2104_v22 = vpop.xlane.xlu1 %2103 }
 0x3b7   : > { %v2133_v54 = vsub.f32 %v2058_v28, %v2104_v22 }
 0x3b9   : > { %v3761_v48 = vpop.eup %2771  ;;  %v2151_v20 = vmul.f32 1.442695, %v2133_v54 }
 0x3ba   : > { %2181 = vadd.xlane.f32.xlu2 %v3761_v48 }
 0x3bb   : > { %2773 = vpow2.f32 %v2151_v20 }
 0x3be   : > { %v2106_v39 = vpop.xlane.xlu1 %2105 }
 0x3bf   : > { %v2134_v1 = vsub.f32 %v2061_v10, %v2106_v39 }
 0x3c1   : > { %v3764_v2 = vpop.eup %2773  ;;  %v2153_v3 = vmul.f32 1.442695, %v2134_v1 }
 0x3c2   : > { %2183 = vadd.xlane.f32.xlu0 %v3764_v2 }
 0x3c3   : > { %2775 = vpow2.f32 %v2153_v3 }
 0x3c6   : > { %v2108_v11 = vpop.xlane.xlu2 %2107 }
 0x3c7   : > { %v2135_v12 = vsub.f32 %v2064_v31, %v2108_v11 }
 0x3c9   : > { %v3767_v58 = vpop.eup %2775  ;;  %v2155_v59 = vmul.f32 1.442695, %v2135_v12 }
 0x3ca   : > { %2185 = vadd.xlane.f32.xlu1 %v3767_v58 }
 0x3cb   : > { %2777 = vpow2.f32 %v2155_v59 }
 0x3ce   : > { %v2110_v30 = vpop.xlane.xlu2 %2109 }
 0x3cf   : > { %v2136_v15 = vsub.f32 %v3725_v35, %v2110_v30 }
 0x3d1   : > { %v3771_v9 = vpop.eup %2777  ;;  %v2157_v16 = vmul.f32 1.442695, %v2136_v15 }
 0x3d2   : > { %2187 = vadd.xlane.f32.xlu2 %v3771_v9 }
 0x3d3   : > { %2779 = vpow2.f32 %v2157_v16 }
 0x3d6   : > { %v2112_v4 = vpop.xlane.xlu0 %2111 }
 0x3d7   : > { %v2137_v34 = vsub.f32 %v3728_v32, %v2112_v4 }
 0x3d9   : > { %v3775_v23 = vpop.eup %2779  ;;  %v2159_v24 = vmul.f32 1.442695, %v2137_v34 }
 0x3da   : > { %2189 = vadd.xlane.f32.xlu0 %v3775_v23 }
 0x3db   : > { %2781 = vpow2.f32 %v2159_v24 }
 0x3de   : > { %v2114_v63 = vpop.xlane.xlu1 %2113 }
 0x3df   : > { %v2138_v18 = vsub.f32 %v3731_v38, %v2114_v63 }
 0x3e1   : > { %v3779_v8 = vpop.eup %2781  ;;  %v2161_v14 = vmul.f32 1.442695, %v2138_v18 }
 0x3e2   : > { %2191 = vadd.xlane.f32.xlu1 %v3779_v8 }
 0x3e3   : > { %2783 = vpow2.f32 %v2161_v14 }
 0x3e6   : > { %v2116_v60 = vpop.xlane.xlu2 %2115 }
 0x3e7   : > { %v2139_v25 = vsub.f32 %v3734_v41, %v2116_v60 }
 0x3e9   : > { %v3783_v17 = vpop.eup %2783  ;;  %v2163_v56 = vmul.f32 1.442695, %v2139_v25 }
 0x3ea   : > { %2193 = vadd.xlane.f32.xlu2 %v3783_v17 }
 0x3eb   : > { %2785 = vpow2.f32 %v2163_v56 }
 0x3ee   : > { %v2118_v47 = vpop.xlane.xlu0 %2117 }
 0x3ef   : > { %v2140_v27 = vsub.f32 %v3737_v44, %v2118_v47 }
 0x3f1   : > { %v3787_v28 = vpop.eup %2785  ;;  %v2165_v6 = vmul.f32 1.442695, %v2140_v27 }
 0x3f2   : > { %2195 = vadd.xlane.f32.xlu0 %v3787_v28 }
 0x3f3   : > { %2787 = vpow2.f32 %v2165_v6 }
 0x3f6   : > { %v2120_v10 = vpop.xlane.xlu1 %2119 }
 0x3f7   : > { %v2141_v0 = vsub.f32 %v3740_v46, %v2120_v10 }
 0x3f9   : > { %v3791_v31 = vpop.eup %2787  ;;  %v2167_v29 = vmul.f32 1.442695, %v2141_v0 }
 0x3fa   : > { %2197 = vadd.xlane.f32.xlu1 %v3791_v31 }
 0x3fb   : > { %2789 = vpow2.f32 %v2167_v29 }
 0x3fe   : > { %v2122_v35 = vpop.xlane.xlu2 %2121 }
 0x3ff   : > { %v2142_v36 = vsub.f32 %v3743_v40, %v2122_v35 }
 0x401   : > { %v3795_v32 = vpop.eup %2789  ;;  %v2169_v7 = vmul.f32 1.442695, %v2142_v36 }
 0x402   : > { %2199 = vadd.xlane.f32.xlu2 %v3795_v32 }
 0x403   : > { %2791 = vpow2.f32 %v2169_v7 }
 0x409   : > { %v3798_v38 = vpop.eup %2791 }
 0x40a   : > { %2201 = vadd.xlane.f32.xlu0 %v3798_v38 }
 0x40c   : > { %v2124_v26 = vpop.xlane.xlu0 %2123 }
 0x40d   : > { %v2143_v41 = vsub.f32 %v3746_v49, %v2124_v26 }
 0x40f   : > { %v2171_v42 = vmul.f32 1.442695, %v2143_v41 }
 0x411   : > { %2793 = vpow2.f32 %v2171_v42 }
 0x414   : > { %v2126_v44 = vpop.xlane.xlu1 %2125 }
 0x415   : > { %v2144_v45 = vsub.f32 %v3749_v37, %v2126_v44 }
 0x417   : > { %v3803_v46 = vpop.eup %2793  ;;  %v2173_v50 = vmul.f32 1.442695, %v2144_v45 }
 0x418   : > { %2203 = vadd.xlane.f32.xlu1 %v3803_v46 }
 0x419   : > { %2795 = vpow2.f32 %v2173_v50 }
 0x41c   : > { %v2128_v40 = vpop.xlane.xlu2 %2127 }
 0x41d   : > { %v2145_v33 = vsub.f32 %v3752_v5, %v2128_v40 }
 0x41f   : > { %v3807_v61 = vpop.eup %2795  ;;  %v2175_v19 = vmul.f32 1.442695, %v2145_v33 }
 0x420   : > { %2205 = vadd.xlane.f32.xlu2 %v3807_v61 }
 0x421   : > { %2797 = vpow2.f32 %v2175_v19 }
 0x424   : > { %v2130_v49 = vpop.xlane.xlu0 %2129 }
 0x425   : > { %v2146_v37 = vsub.f32 %v3755_v52, %v2130_v49  ;;  %v2180_v21 = vpop.xlane.xlu1 %2179 }
 0x426   : > { %2799 = vrcp.f32 %v2180_v21 }
 0x427   : > { %v3811_v13 = vpop.eup %2797  ;;  %v2177_v53 = vmul.f32 1.442695, %v2146_v37 }
 0x428   : > { %2207 = vadd.xlane.f32.xlu0 %v3811_v13 }
 0x429   : > { %2801 = vpow2.f32 %v2177_v53 }
 0x42c   : > { %v2800_v5 = vpop.eup %2799 }
 0x42d   : > { %v2227_v55 = vmul.f32 %v2800_v5, %v3757_v62  ;;  %v2182_v57 = vpop.xlane.xlu2 %2181 }
 0x42e   : > { %2803 = vrcp.f32 %v2182_v57 }
 0x42f   : > { %v3824_v52 = vpop.eup %2801  ;;  %2243 = vst [vmem:[%s3828_s27] sm:$0xff] %v2227_v55 }
 0x430   : > { %2209 = vadd.xlane.f32.xlu1 %v3824_v52 }
 0x431   : > { %2862 = shalt.err (!%p2859_p5)
}
 0x432   : > { %s2931_s1 = smov 128   ;;  %s2932_s2 = smov 8  }
 0x433   : > { %2527 = dma.vmem_to_hbm [thread:$0]  (%p3026_p6), %s2278_s21, 2048, %s2280_s25, %s2260_s17, %s2931_s1, %s2931_s1, %s2932_s2  }
 0x434   : > { %v2804_v43 = vpop.eup %2803  ;;  %s2293_s25 = scalar_lea.hbm %s3923_s10, %s3816_s30  ;;  %s2294_s17 = sshll.u32 %s3828_s27, 4  ;;  %s2295_s17 = int_to_ptr.vmem [resolvable:$true] %s2294_s17 }
 0x435   : > { %v2228_v62 = vmul.f32 %v2804_v43, %v3761_v48  ;;  %v2184_v51 = vpop.xlane.xlu0 %2183  ;;  %s2296_s29 = sshll.u32 %s2293_s25, 4  ;;  %s2265_s11 = scalar_lea.sflag [#allocation6], %s3116_s20  ;;  %s2297_s29 = int_to_ptr.hbm [resolvable:$true] %s2296_s29 }
 0x436   : > { %2805 = vrcp.f32 %v2184_v51  ;;  %s2877_s28 = sshra.s32 %s2297_s29, 4  ;;  %s2883_s30 = scalar_lea.hbm %s3923_s10, 256  ;;  %s2878_s28 = int_to_ptr.hbm [resolvable:$true] %s2877_s28 }
 0x437   : > { %2244 = vst [vmem:[%s3828_s27 + $0x8] sm:$0xff] %v2228_v62  ;;  %s2879_s12 = scalar_lea.hbm %s2878_s28, 128  ;;  %p2884_p12 = scmp.lt.s32.totalorder %s2878_s28, %s3923_s10 }
 0x438   : > { %p2880_p7 = scmp.ne.s32.totalorder %s2878_s28, %s2879_s12  ;;  %p2885_p13 = scmp.lt.s32.totalorder %s2883_s30, %s2879_s12 }
 0x43a   : > { %p2881_p10 = pnand %p2880_p7, %p3026_p6  ;;  %p2886_p0 = por %p2885_p13, %p2884_p12 }
 0x43c   : > { %v2806_v22 = vpop.eup %2805  ;;  %p2882_p11 = pneg %p2881_p10 }
 0x43d   : > { %v2229_v54 = vmul.f32 %v2806_v22, %v3764_v2  ;;  %v2186_v20 = vpop.xlane.xlu1 %2185 }
 0x43e   : > { %2807 = vrcp.f32 %v2186_v20  ;;  %p2887_p1 = pnand %p2886_p0, %p2882_p11 }
 0x43f   : > { %2245 = vst [vmem:[%s3828_s27 + $0x10] sm:$0xff] %v2229_v54 }
 0x444   : > { %v2808_v39 = vpop.eup %2807 }
 0x445   : > { %v2230_v1 = vmul.f32 %v2808_v39, %v3767_v58  ;;  %v2188_v3 = vpop.xlane.xlu2 %2187 }
 0x446   : > { %2809 = vrcp.f32 %v2188_v3 }
 0x447   : > { %2246 = vst [vmem:[%s3828_s27 + $0x18] sm:$0xff] %v2230_v1 }
 0x44c   : > { %v2810_v11 = vpop.eup %2809 }
 0x44d   : > { %v2231_v48 = vmul.f32 %v2810_v11, %v3771_v9  ;;  %v2190_v12 = vpop.xlane.xlu0 %2189 }
 0x44e   : > { %2811 = vrcp.f32 %v2190_v12 }
 0x44f   : > { %2247 = vst [vmem:[%s3828_s27 + $0x20] sm:$0xff] %v2231_v48 }
 0x454   : > { %v2812_v59 = vpop.eup %2811 }
 0x455   : > { %v2232_v2 = vmul.f32 %v2812_v59, %v3775_v23  ;;  %v2192_v30 = vpop.xlane.xlu1 %2191 }
 0x456   : > { %2813 = vrcp.f32 %v2192_v30 }
 0x457   : > { %2248 = vst [vmem:[%s3828_s27 + $0x28] sm:$0xff] %v2232_v2 }
 0x45c   : > { %v2814_v15 = vpop.eup %2813 }
 0x45d   : > { %v2233_v58 = vmul.f32 %v2814_v15, %v3779_v8  ;;  %v2194_v16 = vpop.xlane.xlu2 %2193 }
 0x45e   : > { %2815 = vrcp.f32 %v2194_v16 }
 0x45f   : > { %2249 = vst [vmem:[%s3828_s27 + $0x30] sm:$0xff] %v2233_v58 }
 0x464   : > { %v2816_v4 = vpop.eup %2815 }
 0x465   : > { %v2234_v9 = vmul.f32 %v2816_v4, %v3783_v17  ;;  %v2196_v34 = vpop.xlane.xlu0 %2195 }
 0x466   : > { %2817 = vrcp.f32 %v2196_v34 }
 0x467   : > { %2250 = vst [vmem:[%s3828_s27 + $0x38] sm:$0xff] %v2234_v9 }
 0x46c   : > { %v2818_v24 = vpop.eup %2817 }
 0x46d   : > { %v2235_v23 = vmul.f32 %v2818_v24, %v3787_v28  ;;  %v2198_v63 = vpop.xlane.xlu1 %2197 }
 0x46e   : > { %2819 = vrcp.f32 %v2198_v63 }
 0x46f   : > { %2251 = vst [vmem:[%s3828_s27 + $0x40] sm:$0xff] %v2235_v23 }
 0x474   : > { %v2820_v18 = vpop.eup %2819 }
 0x475   : > { %v2236_v8 = vmul.f32 %v2820_v18, %v3791_v31  ;;  %v2200_v14 = vpop.xlane.xlu2 %2199 }
 0x476   : > { %2821 = vrcp.f32 %v2200_v14 }
 0x477   : > { %2252 = vst [vmem:[%s3828_s27 + $0x48] sm:$0xff] %v2236_v8 }
 0x47c   : > { %v2822_v60 = vpop.eup %2821 }
 0x47d   : > { %v2237_v25 = vmul.f32 %v2822_v60, %v3795_v32  ;;  %v2202_v17 = vpop.xlane.xlu0 %2201 }
 0x47e   : > { %2823 = vrcp.f32 %v2202_v17 }
 0x47f   : > { %2253 = vst [vmem:[%s3828_s27 + $0x50] sm:$0xff] %v2237_v25 }
 0x484   : > { %v2824_v56 = vpop.eup %2823 }
 0x485   : > { %v2238_v47 = vmul.f32 %v2824_v56, %v3798_v38 }
 0x487   : > { %2254 = vst [vmem:[%s3828_s27 + $0x58] sm:$0xff] %v2238_v47 }
 0x48b   : > { %v2204_v27 = vpop.xlane.xlu1 %2203 }
 0x48c   : > { %2825 = vrcp.f32 %v2204_v27 }
 0x492   : > { %v2826_v28 = vpop.eup %2825 }
 0x493   : > { %v2239_v6 = vmul.f32 %v2826_v28, %v3803_v46  ;;  %v2206_v10 = vpop.xlane.xlu2 %2205 }
 0x494   : > { %2827 = vrcp.f32 %v2206_v10 }
 0x495   : > { %2255 = vst [vmem:[%s3828_s27 + $0x60] sm:$0xff] %v2239_v6 }
 0x49a   : > { %v2828_v0 = vpop.eup %2827 }
 0x49b   : > { %v2240_v31 = vmul.f32 %v2828_v0, %v3807_v61  ;;  %v2208_v29 = vpop.xlane.xlu0 %2207 }
 0x49c   : > { %2829 = vrcp.f32 %v2208_v29 }
 0x49d   : > { %2256 = vst [vmem:[%s3828_s27 + $0x68] sm:$0xff] %v2240_v31 }
 0x4a2   : > { %v2830_v35 = vpop.eup %2829 }
 0x4a3   : > { %v2241_v36 = vmul.f32 %v2830_v35, %v3811_v13  ;;  %v2210_v32 = vpop.xlane.xlu1 %2209 }
 0x4a4   : > { %2831 = vrcp.f32 %v2210_v32 }
 0x4a5   : > { %2257 = vst [vmem:[%s3828_s27 + $0x70] sm:$0xff] %v2241_v36 }
 0x4aa   : > { %v2832_v7 = vpop.eup %2831 }
 0x4ab   : > { %v2242_v38 = vmul.f32 %v2832_v7, %v3824_v52 }
 0x4ad   : > { %2258 = vst [vmem:[%s3828_s27 + $0x78] sm:$0xff] %v2242_v38 }
 0x4ae   : > { %2890 = shalt.err (!%p2887_p1)
}
 0x4af   : > { %2528 = dma.vmem_to_hbm [thread:$0]  (%p3026_p6), %s2295_s17, 2048, %s2297_s29, %s2265_s11, %s2931_s1, %s2931_s1, %s2932_s2  }
 0x4b0 PF: > { %s2311_s20 = sand.u32 1, %s2917_s13   ;;  %p2532_p2 = pnand %p2400_p9, %p3030_p8 }
 0x4b1   : > { %s2312_s27 = scalar_lea.sflag [#allocation4], %s2311_s20 }
 0x4b2   : > { %p2533_p3 = pneg %p2532_p2 }
 0x4b4   : > { %2908 = dma.done.wait (%p2533_p3), %s2312_s27, 2048  }
 0x4b5   : > { %2910 = vsyncadd (%p2533_p3), %s2312_s27, 4294965248  ;;  %s2322_s25 = scalar_lea.sflag [#allocation6], %s2311_s20 }
 0x4b6   : > { %2912 = dma.done.wait (%p2533_p3), %s2322_s25, 2048  }
 0x4b7   : > { %2914 = vsyncadd (%p2533_p3), %s2322_s25, 4294965248  ;;  %p24_p6 = scmp.ge.s32.totalorder %s3011_s19, 4   ;;  %s3932_s13 = smov %s2921_s14 }
 0x4b8   : > { %s3933_s14 = smov %s2925_s15  ;;  %s3934_s15 = smov %s3024_s22 }
 0x4b9   : > { %s3935_s16 = smov %s3011_s19  ;;  %26 = sbr.rel (!%p24_p6) target bundleno = 9 (0x9), region = 151 }
 0x4be   :  { %2328 = vsyncpa [#allocation4], 1 }
 0x4bf   :  { %2330 = vsyncpa [#allocation4 + $0x1], 1 }
 0x4c0   :  { %2331 = vsyncpa [#allocation6], 1 }
 0x4c1   :  { %2333 = vsyncpa [#allocation6 + $0x1], 1 }

</bundles_post_ra>
